<compile_context>
chip_gen: v6e
topology: v6e:2x2x1
jax: 0.10.0
libtpu: 0.0.40
codegen_flags: <defaults>
</compile_context>

<pallas_src>
import jax
import jax.numpy as jnp
from jax import lax
from jax.experimental import pallas as pl
from jax.experimental.pallas import tpu as pltpu

BN_EPS = 1e-5


def s2v_kernel(edge_ref, feat_ref, A_ref, M_ref,
               wb_ref, w1_ref, w2_ref, p_ref, out_ref):
    f32 = jnp.float32
    Gt, N, Hp = feat_ref.shape
    R = Gt * N

    # Packed (8, Hp) f32 parameter tile: rows = [b1, b2, g1, be1, g2, be2, 0, 0]
    b1 = p_ref[0:1, :]
    b2 = p_ref[1:2, :]
    g1 = p_ref[2:3, :]
    be1 = p_ref[3:4, :]
    g2 = p_ref[4:5, :]
    be2 = p_ref[5:6, :]

    feat = feat_ref[...]                               # (Gt, N, Hp), compute dtype
    feat2d = feat.reshape(R, Hp)
    feat2d_f32 = feat2d.astype(f32)

    # --- Edge aggregation, reassociated.
    #   edge_ref carries a trailing ones column and wb_ref carries b_bond as its last
    #   row, so  (M @ edge_aug) @ wb_aug  ==  M @ (edge_w @ Wb + b_bond)  exactly.
    edge_agg = jnp.einsum('gne,geb->gnb', M_ref[...], edge_ref[...],
                          preferred_element_type=f32)              # (Gt, N, B+1)
    edge_agg2d = edge_agg.reshape(R, -1).astype(wb_ref.dtype)
    h2 = jnp.dot(edge_agg2d, wb_ref[...], preferred_element_type=f32)   # (R, Hp)

    # --- Node aggregation, reassociated:  A @ (feat @ w1)
    # Big shared-weight matmul runs once over all Gt*N rows (full MXU rows);
    # only the tiny (N,N)@(N,Hp) aggregation stays per graph.
    fw1 = jnp.dot(feat2d, w1_ref[...], preferred_element_type=f32)       # (R, Hp)
    fw1_3d = fw1.astype(A_ref.dtype).reshape(Gt, N, Hp)
    h1w1 = jnp.einsum('gnm,gmh->gnh', A_ref[...], fw1_3d,
                      preferred_element_type=f32).reshape(R, Hp)

    # --- hidden_layer1(h1) + h2 -> BN1 (per-graph training-mode stats) -> ReLU
    t1 = (h1w1 + b1 + h2).reshape(Gt, N, Hp)
    mu1 = jnp.mean(t1, axis=1, keepdims=True)
    var1 = jnp.mean((t1 - mu1) * (t1 - mu1), axis=1, keepdims=True)
    h = jnp.maximum((t1 - mu1) * lax.rsqrt(var1 + BN_EPS) * g1 + be1, 0.0)

    # --- hidden_layer2(h) + features -> BN2 -> ReLU  (dropout = Identity)
    h2d = h.reshape(R, Hp).astype(w2_ref.dtype)
    t2 = (jnp.dot(h2d, w2_ref[...], preferred_element_type=f32)
          + b2 + feat2d_f32).reshape(Gt, N, Hp)
    mu2 = jnp.mean(t2, axis=1, keepdims=True)
    var2 = jnp.mean((t2 - mu2) * (t2 - mu2), axis=1, keepdims=True)
    out = jnp.maximum((t2 - mu2) * lax.rsqrt(var2 + BN_EPS) * g2 + be2, 0.0)
    out_ref[...] = out.astype(out_ref.dtype)


def _choose_gt(G, N, target_rows):
    """Largest divisor of G with Gt*N <= target_rows."""
    best = 1
    for gt in range(1, G + 1):
        if G % gt == 0 and gt * N <= target_rows:
            best = gt
    return best


def prepare_params(w_bond, b_bond, w1, b1, w2, b2, g1, be1, g2, be2,
                   *, Hp, compute_dtype):
    """Pad/pack parameters once (reused across repeated layer calls)."""
    B, H = w_bond.shape
    pad = Hp - H
    f32 = jnp.float32
    # Augmented bond weight: last row carries the bond bias (pairs with the ones
    # column appended to edge_w), so the kernel needs no degree computation.
    wb_aug = jnp.concatenate([w_bond.astype(f32), b_bond.reshape(1, -1).astype(f32)], 0)
    wb_aug = jnp.pad(wb_aug, ((0, 0), (0, pad))).astype(compute_dtype)
    w1_p = jnp.pad(w1.astype(f32), ((0, pad), (0, pad))).astype(compute_dtype)
    w2_p = jnp.pad(w2.astype(f32), ((0, pad), (0, pad))).astype(compute_dtype)
    # Padded gamma/beta columns stay 0 so padded lanes remain exactly 0 through BN+ReLU.
    packed = jnp.zeros((8, Hp), f32)
    for row, v in enumerate((b1, b2, g1, be1, g2, be2)):
        packed = packed.at[row, :H].set(v.reshape(-1).astype(f32))
    return wb_aug, w1_p, w2_p, packed


def structure2vec_layer_padded(edge_w_aug, feat_p, A, M,
                               wb_aug, w1_p, w2_p, packed, *, target_rows=128):
    """One Structure2Vec layer on already padded/cast inputs.

    edge_w_aug: (G, E, B+1)  -- edge features with a trailing ones column
    feat_p:     (G, N, Hp)   -- node features, hidden dim zero-padded to Hp (lane-dense)
    A:          (G, N, N)    -- dst<-src adjacency (multi-edge counts)
    M:          (G, N, E)    -- dst<-edge incidence
    Returns padded (G, N, Hp) output in feat_p.dtype so repeated layers chain with no
    per-call pad/slice HBM passes.
    target_rows: Gt*N rows per grid step; 128 fills a v5e MXU pass, use 256 on v6e/v7x.
    """
    G, N, Hp = feat_p.shape
    _, E, B1 = edge_w_aug.shape
    Gt = _choose_gt(G, N, target_rows)
    steps = G // Gt

    in_specs = [
        pl.BlockSpec((Gt, E, B1), lambda s: (s, 0, 0)),   # edge_w (+ ones col)
        pl.BlockSpec((Gt, N, Hp), lambda s: (s, 0, 0)),   # features (padded)
        pl.BlockSpec((Gt, N, N), lambda s: (s, 0, 0)),    # adjacency
        pl.BlockSpec((Gt, N, E), lambda s: (s, 0, 0)),    # incidence
        pl.BlockSpec((B1, Hp), lambda s: (0, 0)),         # [Wb ; b_bond]  (shared)
        pl.BlockSpec((Hp, Hp), lambda s: (0, 0)),         # w1             (shared)
        pl.BlockSpec((Hp, Hp), lambda s: (0, 0)),         # w2             (shared)
        pl.BlockSpec((8, Hp), lambda s: (0, 0)),          # packed biases / BN params
    ]
    out_specs = pl.BlockSpec((Gt, N, Hp), lambda s: (s, 0, 0))

    return pl.pallas_call(
        s2v_kernel,
        out_shape=jax.ShapeDtypeStruct((G, N, Hp), feat_p.dtype),
        grid=(steps,),
        in_specs=in_specs,
        out_specs=out_specs,
        compiler_params=pltpu.CompilerParams(
            dimension_semantics=("parallel",)),
    )(edge_w_aug, feat_p, A, M, wb_aug, w1_p, w2_p, packed)


def reference_single(edge_w, features, A, M,
                     w_bond, b_bond, w1, b1, w2, b2, g1, be1, g2, be2):
    # Original (non-reassociated, un-padded) per-graph formulation.
    edge_h = edge_w @ w_bond + b_bond
    h1 = A @ features
    h2 = M @ edge_h
    t1 = h1 @ w1 + b1 + h2
    mu1 = t1.mean(0, keepdims=True)
    v1 = ((t1 - mu1) ** 2).mean(0, keepdims=True)
    h = jnp.maximum((t1 - mu1) / jnp.sqrt(v1 + BN_EPS) * g1 + be1, 0.0)
    t2 = h @ w2 + b2 + features
    mu2 = t2.mean(0, keepdims=True)
    v2 = ((t2 - mu2) ** 2).mean(0, keepdims=True)
    return jnp.maximum((t2 - mu2) / jnp.sqrt(v2 + BN_EPS) * g2 + be2, 0.0)


if __name__ == "__main__":
    # Small synthetic batch of graphs.
    G = 16     # graphs in the batch
    N = 16     # nodes per graph     -> Gt = 8 graphs/step (128 rows), grid = (2,)
    E = 32     # edges per graph
    H = 32     # num_hidden_features (node feature dim)
    B = 8      # num_bond_features
    Hp = max(128, ((H + 127) // 128) * 128)

    key = jax.random.PRNGKey(0)
    ks = jax.random.split(key, 8)

    # Graph structure (deterministic random edge lists, one per graph)
    src = jax.random.randint(ks[0], (G, E), 0, N)
    dst = jax.random.randint(ks[1], (G, E), 0, N)
    eidx = jnp.arange(E)

    def build_graph(s, d):
        Ad = jnp.zeros((N, N), jnp.float32).at[d, s].add(1.0)   # multi-edge aware
        Md = jnp.zeros((N, E), jnp.float32).at[d, eidx].set(1.0)
        return Ad, Md

    A, M = jax.vmap(build_graph)(src, dst)

    # Inputs
    features = jax.random.normal(ks[2], (G, N, H), jnp.float32)
    edge_w = jax.random.normal(ks[3], (G, E, B), jnp.float32)

    # Parameters (Linear weights pre-transposed so kernel does x @ W)
    w_bond = jax.random.normal(ks[4], (B, H), jnp.float32) * 0.1
    b_bond = jnp.full((H,), 0.01, jnp.float32)
    w1 = jax.random.normal(ks[5], (H, H), jnp.float32) * 0.1
    b1 = jnp.full((H,), 0.02, jnp.float32)
    w2 = jax.random.normal(ks[6], (H, H), jnp.float32) * 0.1
    b2 = jnp.full((H,), 0.03, jnp.float32)
    g1 = jnp.ones((H,), jnp.float32) * 1.1
    be1 = jnp.full((H,), -0.05, jnp.float32)
    g2 = jnp.ones((H,), jnp.float32) * 0.9
    be2 = jnp.full((H,), 0.05, jnp.float32)

    ref = jax.vmap(lambda ew, f, a, m: reference_single(
        ew, f, a, m, w_bond, b_bond, w1, b1, w2, b2, g1, be1, g2, be2))(
        edge_w, features, A, M)

    # One-time (stack-boundary) layout prep: append ones column to edge features and
    # zero-pad node features to the lane-dense Hp layout. Repeated layer calls would
    # chain in this padded layout with no further pad/slice.
    ones_col = jnp.ones((G, E, 1), jnp.float32)

    # f32 path (bit-for-bit vs reference up to reassociation), then bf16 MXU path
    # (v6e/v7x feedback: half the HBM/VMEM bytes, double MXU throughput; BN stays f32).
    for compute_dtype, atol in ((jnp.float32, 5e-4), (jnp.bfloat16, 6e-2)):
        wb_aug, w1_p, w2_p, packed = prepare_params(
            w_bond, b_bond, w1, b1, w2, b2, g1, be1, g2, be2,
            Hp=Hp, compute_dtype=compute_dtype)
        edge_aug = jnp.concatenate([edge_w, ones_col], axis=-1).astype(compute_dtype)
        feat_p = jnp.pad(features, ((0, 0), (0, 0), (0, Hp - H))).astype(compute_dtype)
        A_c = A.astype(compute_dtype)       # 0/1 values: exact in bf16
        M_c = M.astype(compute_dtype)

        out_p = structure2vec_layer_padded(
            edge_aug, feat_p, A_c, M_c, wb_aug, w1_p, w2_p, packed, target_rows=128)
        out_p = jax.block_until_ready(out_p)

        out = out_p[:, :, :H].astype(jnp.float32)
        assert out.shape == (G, N, H)
        err = float(jnp.max(jnp.abs(out - ref)))
        assert err <= atol, f"mismatch vs JAX reference ({compute_dtype}): {err}"

    print("KERNEL_OK")
</pallas_src>

<mosaic_0001>
module attributes {stable_mosaic.version = 11 : i64} {
  func.func @s2v_kernel(%arg0: i32, %arg1: memref<8x32x9xf32, #tpu.memory_space<vmem>>, %arg2: memref<8x16x128xf32, #tpu.memory_space<vmem>>, %arg3: memref<8x16x16xf32, #tpu.memory_space<vmem>>, %arg4: memref<8x16x32xf32, #tpu.memory_space<vmem>>, %arg5: memref<9x128xf32, #tpu.memory_space<vmem>>, %arg6: memref<128x128xf32, #tpu.memory_space<vmem>>, %arg7: memref<128x128xf32, #tpu.memory_space<vmem>>, %arg8: memref<8x128xf32, #tpu.memory_space<vmem>>, %arg9: memref<8x16x128xf32, #tpu.memory_space<vmem>>) attributes {dimension_semantics = [#tpu.dimension_semantics<parallel>], iteration_bounds = array<i64: 2>, scalar_prefetch = 0 : i64, scratch_operands = 0 : i64, tpu.core_type = #tpu.core_type<tc>, window_params = [{transform_indices = @transform_0, window_bounds = array<i64: 8, 32, 9>}, {transform_indices = @transform_1, window_bounds = array<i64: 8, 16, 128>}, {transform_indices = @transform_2, window_bounds = array<i64: 8, 16, 16>}, {transform_indices = @transform_3, window_bounds = array<i64: 8, 16, 32>}, {pipeline_mode = #tpu.pipeline_mode<synchronous>, transform_indices = @transform_4, window_bounds = array<i64: 9, 128>}, {pipeline_mode = #tpu.pipeline_mode<synchronous>, transform_indices = @transform_5, window_bounds = array<i64: 128, 128>}, {pipeline_mode = #tpu.pipeline_mode<synchronous>, transform_indices = @transform_6, window_bounds = array<i64: 128, 128>}, {pipeline_mode = #tpu.pipeline_mode<synchronous>, transform_indices = @transform_7, window_bounds = array<i64: 8, 128>}, {transform_indices = @transform_8, window_bounds = array<i64: 8, 16, 128>}]} {
    %c0 = arith.constant 0 : index
    %c0_0 = arith.constant 0 : index
    %0 = vector.load %arg8[%c0, %c0_0] : memref<8x128xf32, #tpu.memory_space<vmem>>, vector<1x128xf32>
    %c1 = arith.constant 1 : index
    %c0_1 = arith.constant 0 : index
    %1 = vector.load %arg8[%c1, %c0_1] : memref<8x128xf32, #tpu.memory_space<vmem>>, vector<1x128xf32>
    %c2 = arith.constant 2 : index
    %c0_2 = arith.constant 0 : index
    %2 = vector.load %arg8[%c2, %c0_2] : memref<8x128xf32, #tpu.memory_space<vmem>>, vector<1x128xf32>
    %c3 = arith.constant 3 : index
    %c0_3 = arith.constant 0 : index
    %3 = vector.load %arg8[%c3, %c0_3] : memref<8x128xf32, #tpu.memory_space<vmem>>, vector<1x128xf32>
    %c4 = arith.constant 4 : index
    %c0_4 = arith.constant 0 : index
    %4 = vector.load %arg8[%c4, %c0_4] : memref<8x128xf32, #tpu.memory_space<vmem>>, vector<1x128xf32>
    %c5 = arith.constant 5 : index
    %c0_5 = arith.constant 0 : index
    %5 = vector.load %arg8[%c5, %c0_5] : memref<8x128xf32, #tpu.memory_space<vmem>>, vector<1x128xf32>
    %c0_6 = arith.constant 0 : index
    %c0_7 = arith.constant 0 : index
    %c0_8 = arith.constant 0 : index
    %6 = vector.load %arg2[%c0_6, %c0_7, %c0_8] : memref<8x16x128xf32, #tpu.memory_space<vmem>>, vector<8x16x128xf32>
    %7 = vector.shape_cast %6 : vector<8x16x128xf32> to vector<128x128xf32>
    %c0_9 = arith.constant 0 : index
    %c0_10 = arith.constant 0 : index
    %c0_11 = arith.constant 0 : index
    %8 = vector.load %arg4[%c0_9, %c0_10, %c0_11] : memref<8x16x32xf32, #tpu.memory_space<vmem>>, vector<8x16x32xf32>
    %c0_12 = arith.constant 0 : index
    %c0_13 = arith.constant 0 : index
    %c0_14 = arith.constant 0 : index
    %9 = vector.load %arg1[%c0_12, %c0_13, %c0_14] : memref<8x32x9xf32, #tpu.memory_space<vmem>>, vector<8x32x9xf32>
    "tpu.trace_start"() <{level = 10 : i32, message = "gne,geb->gnb"}> : () -> ()
    %cst = arith.constant dense<0.000000e+00> : vector<8x16x9xf32>
    %10 = tpu.matmul %8, %9, %cst {dimension_numbers = #tpu.dot_dimension_numbers<[2], [1], [1], [2], [0, 0, 0, 1, 1, 2], [0], [0]>} : vector<8x16x32xf32>, vector<8x32x9xf32>, vector<8x16x9xf32> -> vector<8x16x9xf32>
    "tpu.trace_stop"() : () -> ()
    %11 = vector.shape_cast %10 : vector<8x16x9xf32> to vector<128x9xf32>
    %c0_15 = arith.constant 0 : index
    %c0_16 = arith.constant 0 : index
    %12 = vector.load %arg5[%c0_15, %c0_16] : memref<9x128xf32, #tpu.memory_space<vmem>>, vector<9x128xf32>
    %cst_17 = arith.constant dense<0.000000e+00> : vector<128x128xf32>
    %13 = tpu.matmul %11, %12, %cst_17 {dimension_numbers = #tpu.dot_dimension_numbers<[1], [0], [0], [1], [0, 0, 1, 1], [], []>} : vector<128x9xf32>, vector<9x128xf32>, vector<128x128xf32> -> vector<128x128xf32>
    %c0_18 = arith.constant 0 : index
    %c0_19 = arith.constant 0 : index
    %14 = vector.load %arg6[%c0_18, %c0_19] : memref<128x128xf32, #tpu.memory_space<vmem>>, vector<128x128xf32>
    %cst_20 = arith.constant dense<0.000000e+00> : vector<128x128xf32>
    %15 = tpu.matmul %7, %14, %cst_20 {dimension_numbers = #tpu.dot_dimension_numbers<[1], [0], [0], [1], [0, 0, 1, 1], [], []>} : vector<128x128xf32>, vector<128x128xf32>, vector<128x128xf32> -> vector<128x128xf32>
    %16 = vector.shape_cast %15 : vector<128x128xf32> to vector<8x16x128xf32>
    %c0_21 = arith.constant 0 : index
    %c0_22 = arith.constant 0 : index
    %c0_23 = arith.constant 0 : index
    %17 = vector.load %arg3[%c0_21, %c0_22, %c0_23] : memref<8x16x16xf32, #tpu.memory_space<vmem>>, vector<8x16x16xf32>
    "tpu.trace_start"() <{level = 10 : i32, message = "gnm,gmh->gnh"}> : () -> ()
    %cst_24 = arith.constant dense<0.000000e+00> : vector<8x16x128xf32>
    %18 = tpu.matmul %17, %16, %cst_24 {dimension_numbers = #tpu.dot_dimension_numbers<[2], [1], [1], [2], [0, 0, 0, 1, 1, 2], [0], [0]>} : vector<8x16x16xf32>, vector<8x16x128xf32>, vector<8x16x128xf32> -> vector<8x16x128xf32>
    "tpu.trace_stop"() : () -> ()
    %19 = vector.shape_cast %18 : vector<8x16x128xf32> to vector<128x128xf32>
    %20 = vector.broadcast %0 : vector<1x128xf32> to vector<128x128xf32>
    %21 = arith.addf %19, %20 : vector<128x128xf32>
    %22 = arith.addf %21, %13 : vector<128x128xf32>
    %23 = vector.shape_cast %22 : vector<128x128xf32> to vector<8x16x128xf32>
    %cst_25 = arith.constant dense<0.000000e+00> : vector<8x128xf32>
    %24 = vector.multi_reduction <add>, %23, %cst_25 [1] : vector<8x16x128xf32> to vector<8x128xf32>
    %25 = vector.shape_cast %24 : vector<8x128xf32> to vector<8x1x128xf32>
    %cst_26 = arith.constant 1.600000e+01 : f32
    %26 = vector.broadcast %cst_26 : f32 to vector<8x1x128xf32>
    %27 = arith.divf %25, %26 : vector<8x1x128xf32>
    %28 = vector.broadcast %27 : vector<8x1x128xf32> to vector<8x16x128xf32>
    %29 = arith.subf %23, %28 : vector<8x16x128xf32>
    %30 = vector.broadcast %27 : vector<8x1x128xf32> to vector<8x16x128xf32>
    %31 = arith.subf %23, %30 : vector<8x16x128xf32>
    %32 = arith.mulf %29, %31 : vector<8x16x128xf32>
    %cst_27 = arith.constant dense<0.000000e+00> : vector<8x128xf32>
    %33 = vector.multi_reduction <add>, %32, %cst_27 [1] : vector<8x16x128xf32> to vector<8x128xf32>
    %34 = vector.shape_cast %33 : vector<8x128xf32> to vector<8x1x128xf32>
    %cst_28 = arith.constant 1.600000e+01 : f32
    %35 = vector.broadcast %cst_28 : f32 to vector<8x1x128xf32>
    %36 = arith.divf %34, %35 : vector<8x1x128xf32>
    %37 = vector.broadcast %27 : vector<8x1x128xf32> to vector<8x16x128xf32>
    %38 = arith.subf %23, %37 : vector<8x16x128xf32>
    %cst_29 = arith.constant 9.99999974E-6 : f32
    %39 = vector.broadcast %cst_29 : f32 to vector<8x1x128xf32>
    %40 = arith.addf %36, %39 : vector<8x1x128xf32>
    %41 = math.rsqrt %40 : vector<8x1x128xf32>
    %42 = vector.broadcast %41 : vector<8x1x128xf32> to vector<8x16x128xf32>
    %43 = arith.mulf %38, %42 : vector<8x16x128xf32>
    %44 = vector.shape_cast %2 : vector<1x128xf32> to vector<1x1x128xf32>
    %45 = vector.broadcast %44 : vector<1x1x128xf32> to vector<8x16x128xf32>
    %46 = arith.mulf %43, %45 : vector<8x16x128xf32>
    %47 = vector.shape_cast %3 : vector<1x128xf32> to vector<1x1x128xf32>
    %48 = vector.broadcast %47 : vector<1x1x128xf32> to vector<8x16x128xf32>
    %49 = arith.addf %46, %48 : vector<8x16x128xf32>
    %cst_30 = arith.constant 0.000000e+00 : f32
    %50 = vector.broadcast %cst_30 : f32 to vector<8x16x128xf32>
    %51 = arith.maximumf %49, %50 : vector<8x16x128xf32>
    %52 = vector.shape_cast %51 : vector<8x16x128xf32> to vector<128x128xf32>
    %c0_31 = arith.constant 0 : index
    %c0_32 = arith.constant 0 : index
    %53 = vector.load %arg7[%c0_31, %c0_32] : memref<128x128xf32, #tpu.memory_space<vmem>>, vector<128x128xf32>
    %cst_33 = arith.constant dense<0.000000e+00> : vector<128x128xf32>
    %54 = tpu.matmul %52, %53, %cst_33 {dimension_numbers = #tpu.dot_dimension_numbers<[1], [0], [0], [1], [0, 0, 1, 1], [], []>} : vector<128x128xf32>, vector<128x128xf32>, vector<128x128xf32> -> vector<128x128xf32>
    %55 = vector.broadcast %1 : vector<1x128xf32> to vector<128x128xf32>
    %56 = arith.addf %54, %55 : vector<128x128xf32>
    %57 = arith.addf %56, %7 : vector<128x128xf32>
    %58 = vector.shape_cast %57 : vector<128x128xf32> to vector<8x16x128xf32>
    %cst_34 = arith.constant dense<0.000000e+00> : vector<8x128xf32>
    %59 = vector.multi_reduction <add>, %58, %cst_34 [1] : vector<8x16x128xf32> to vector<8x128xf32>
    %60 = vector.shape_cast %59 : vector<8x128xf32> to vector<8x1x128xf32>
    %cst_35 = arith.constant 1.600000e+01 : f32
    %61 = vector.broadcast %cst_35 : f32 to vector<8x1x128xf32>
    %62 = arith.divf %60, %61 : vector<8x1x128xf32>
    %63 = vector.broadcast %62 : vector<8x1x128xf32> to vector<8x16x128xf32>
    %64 = arith.subf %58, %63 : vector<8x16x128xf32>
    %65 = vector.broadcast %62 : vector<8x1x128xf32> to vector<8x16x128xf32>
    %66 = arith.subf %58, %65 : vector<8x16x128xf32>
    %67 = arith.mulf %64, %66 : vector<8x16x128xf32>
    %cst_36 = arith.constant dense<0.000000e+00> : vector<8x128xf32>
    %68 = vector.multi_reduction <add>, %67, %cst_36 [1] : vector<8x16x128xf32> to vector<8x128xf32>
    %69 = vector.shape_cast %68 : vector<8x128xf32> to vector<8x1x128xf32>
    %cst_37 = arith.constant 1.600000e+01 : f32
    %70 = vector.broadcast %cst_37 : f32 to vector<8x1x128xf32>
    %71 = arith.divf %69, %70 : vector<8x1x128xf32>
    %72 = vector.broadcast %62 : vector<8x1x128xf32> to vector<8x16x128xf32>
    %73 = arith.subf %58, %72 : vector<8x16x128xf32>
    %cst_38 = arith.constant 9.99999974E-6 : f32
    %74 = vector.broadcast %cst_38 : f32 to vector<8x1x128xf32>
    %75 = arith.addf %71, %74 : vector<8x1x128xf32>
    %76 = math.rsqrt %75 : vector<8x1x128xf32>
    %77 = vector.broadcast %76 : vector<8x1x128xf32> to vector<8x16x128xf32>
    %78 = arith.mulf %73, %77 : vector<8x16x128xf32>
    %79 = vector.shape_cast %4 : vector<1x128xf32> to vector<1x1x128xf32>
    %80 = vector.broadcast %79 : vector<1x1x128xf32> to vector<8x16x128xf32>
    %81 = arith.mulf %78, %80 : vector<8x16x128xf32>
    %82 = vector.shape_cast %5 : vector<1x128xf32> to vector<1x1x128xf32>
    %83 = vector.broadcast %82 : vector<1x1x128xf32> to vector<8x16x128xf32>
    %84 = arith.addf %81, %83 : vector<8x16x128xf32>
    %cst_39 = arith.constant 0.000000e+00 : f32
    %85 = vector.broadcast %cst_39 : f32 to vector<8x16x128xf32>
    %86 = arith.maximumf %84, %85 : vector<8x16x128xf32>
    %c0_40 = arith.constant 0 : index
    %c0_41 = arith.constant 0 : index
    %c0_42 = arith.constant 0 : index
    %87 = vector.load %arg9[%c0_40, %c0_41, %c0_42] : memref<8x16x128xf32, #tpu.memory_space<vmem>>, vector<8x16x128xf32>
    tpu.vector_store %arg9[%c0_40, %c0_41, %c0_42], %86 {strides = array<i32>} : memref<8x16x128xf32, #tpu.memory_space<vmem>>, vector<8x16x128xf32>,
    return
  }
  func.func @transform_0(%arg0: i32) -> (i32, i32, i32) {
    %c0_i32 = arith.constant 0 : i32
    %c0_i32_0 = arith.constant 0 : i32
    %c0_i32_1 = arith.constant 0 : i32
    return %arg0, %c0_i32, %c0_i32_0 : i32, i32, i32
  }
  func.func @transform_1(%arg0: i32) -> (i32, i32, i32) {
    %c0_i32 = arith.constant 0 : i32
    %c0_i32_0 = arith.constant 0 : i32
    %c0_i32_1 = arith.constant 0 : i32
    return %arg0, %c0_i32, %c0_i32_0 : i32, i32, i32
  }
  func.func @transform_2(%arg0: i32) -> (i32, i32, i32) {
    %c0_i32 = arith.constant 0 : i32
    %c0_i32_0 = arith.constant 0 : i32
    %c0_i32_1 = arith.constant 0 : i32
    return %arg0, %c0_i32, %c0_i32_0 : i32, i32, i32
  }
  func.func @transform_3(%arg0: i32) -> (i32, i32, i32) {
    %c0_i32 = arith.constant 0 : i32
    %c0_i32_0 = arith.constant 0 : i32
    %c0_i32_1 = arith.constant 0 : i32
    return %arg0, %c0_i32, %c0_i32_0 : i32, i32, i32
  }
  func.func @transform_4(%arg0: i32) -> (i32, i32) {
    %c0_i32 = arith.constant 0 : i32
    %c0_i32_0 = arith.constant 0 : i32
    %c0_i32_1 = arith.constant 0 : i32
    return %c0_i32, %c0_i32_0 : i32, i32
  }
  func.func @transform_5(%arg0: i32) -> (i32, i32) {
    %c0_i32 = arith.constant 0 : i32
    %c0_i32_0 = arith.constant 0 : i32
    %c0_i32_1 = arith.constant 0 : i32
    return %c0_i32, %c0_i32_0 : i32, i32
  }
  func.func @transform_6(%arg0: i32) -> (i32, i32) {
    %c0_i32 = arith.constant 0 : i32
    %c0_i32_0 = arith.constant 0 : i32
    %c0_i32_1 = arith.constant 0 : i32
    return %c0_i32, %c0_i32_0 : i32, i32
  }
  func.func @transform_7(%arg0: i32) -> (i32, i32) {
    %c0_i32 = arith.constant 0 : i32
    %c0_i32_0 = arith.constant 0 : i32
    %c0_i32_1 = arith.constant 0 : i32
    return %c0_i32, %c0_i32_0 : i32, i32
  }
  func.func @transform_8(%arg0: i32) -> (i32, i32, i32) {
    %c0_i32 = arith.constant 0 : i32
    %c0_i32_0 = arith.constant 0 : i32
    %c0_i32_1 = arith.constant 0 : i32
    return %arg0, %c0_i32, %c0_i32_0 : i32, i32, i32
  }
}

</mosaic_0001>

<bundles_post_ra>
// kernel: tpu_custom_call.1
= control target key start
LH: loop header
LB: loop body
LE: loop exit
PB: predicated region body
PF: predicated region fallthrough
CT: control target
= control target key end

     0   :  { %s4733_s0 = inlined_call_operand.vmem [shape: f32[16,32,9], index: 0, kind: input, shape index: {}]   ;;  %s4734_s1 = inlined_call_operand.vmem [shape: f32[16,16,128], index: 1, kind: input, shape index: {}]   ;;  %s4735_s2 = inlined_call_operand.vmem [shape: f32[16,16,16], index: 2, kind: input, shape index: {}]   ;;  %s4736_s3 = inlined_call_operand.hbm [shape: f32[16,16,32], index: 3, kind: input, shape index: {}]   ;;  %s4737_s4 = inlined_call_operand.vmem [shape: f32[9,128], index: 4, kind: input, shape index: {}]   ;;  %s4738_s5 = inlined_call_operand.vmem [shape: f32[128,128], index: 5, kind: input, shape index: {}]   ;;  %s4739_s6 = inlined_call_operand.hbm [shape: f32[128,128], index: 6, kind: input, shape index: {}]   ;;  %s4740_s7 = inlined_call_operand.hbm [shape: f32[8,128], index: 7, kind: input, shape index: {}]   ;;  %s4741_s8 = inlined_call_operand.hbm [shape: f32[16,16,128], index: 8, kind: output, shape index: {}]  }
   0x1   :  { %4748 = sst [smem:[#allocation12_spill]] %s4739_s6 }
   0x2   :  { %4749 = sst [smem:[#allocation13_spill]] %s4740_s7 }
   0x3   :  { %13 = vsyncpa [#allocation3], 0 }
   0x4   :  { %15 = vsyncpa [#allocation3 + $0x1], 0 }
   0x5   :  { %16 = vsyncpa [#allocation6], 0 }
   0x6   :  { %17 = vsyncpa [#allocation4], 0 }
   0x7   :  { %19 = vsyncpa [#allocation4 + $0x1], 0  ;;  %s3906_s27 = smov 0   ;;  %s3908_s28 = smov 0  }
   0x8   :  { %s3910_s29 = smov 0   ;;  %s3912_s30 = smov 0  }
   0x9 LB: > { %s3927_s9 = sadd.s32 4294967295, %s3851_s30   ;;  %s3047_s10 = sadd.s32 4294967294, %s3851_s30   ;;  %s3851_s30 = sphi %s3912_s30, %s4770_s30   ;;  %s3847_s29 = sphi %s3910_s29, %s4769_s29   ;;  %s3843_s28 = sphi %s3908_s28, %s4768_s28   ;;  %s3839_s27 = sphi %s3906_s27, %s4767_s27  }
   0xa   : > { %p123_p0 = scmp.ne.s32.totalorder %s3843_s28, %s3839_s27  ;;  %p4744_p1 = scmp.eq.s32.totalorder %s3927_s9, 0 }
   0xb   : > { %p231_p2 = scmp.eq.s32.totalorder %s3927_s9, 1  ;;  %p237_p3 = scmp.eq.s32.totalorder %s3047_s10, 1 }
   0xc   : > { %p3936_p4 = por %p4744_p1, %p123_p0  ;;  %p3048_p5 = scmp.ge.s32.totalorder %s3851_s30, 1 }
   0xd   : > { %p3941_p6 = por %p237_p3, %p123_p0  ;;  %p244_p7 = scmp.lt.s32.totalorder %s3851_s30, 3 }
   0xe   : > { %s4750_s11 = scalar_select %p3936_p4, 1, 0 }
   0xf   : > { %s4751_s12 = scalar_select %p3941_p6, 1, 0 }
  0x10   : > { %p3946_p8 = pnand %p3048_p5, %p244_p7  ;;  %s3853_s14 = smov [#allocation5]  }
  0x11   : > { %s262_s15 = sshll.u32 %s3853_s14, 4  ;;  %s3854_s17 = smov [#allocation7]   ;;  %s263_s15 = int_to_ptr.vmem [resolvable:$true] %s262_s15 }
  0x12   : > { %s4752_s13 = scalar_select %p3946_p8, 1, 0 }
  0x13   : > { %p3596_p9 = pneg %p3946_p8  ;;  %s276_s18 = sshll.u32 %s3854_s17, 4  ;;  %s277_s18 = int_to_ptr.vmem [resolvable:$true] %s276_s18 }
  0x14   : > { %s3714_s19 = scalar_lea.vmem %s263_s15, 2048  ;;  %p3722_p5 = scmp.lt.s32.totalorder %s263_s15, %s263_s15 }
  0x15   : > { %p3955_p11 = pnand %p3596_p9, %p4744_p1  ;;  %p3715_p13 = scmp.ne.s32.totalorder %s263_s15, %s3714_s19 }
  0x16   : > { %p3723_p7 = scmp.lt.s32.totalorder %s3714_s19, %s3714_s19 }
  0x17   : > { %p3705_p12 = pneg %p3955_p11 }
  0x18   : > { %p3724_p10 = por %p3723_p7, %p3722_p5 }
  0x19   : > { %p3717_p0 = pnand %p3715_p13, %p3705_p12 }
  0x1b   : > { %p3718_p3 = pneg %p3717_p0 }
  0x1d   : > { %p3725_p9 = pnand %p3724_p10, %p3718_p3 }
  0x1f   : > { %3728 = shalt.err (!%p3725_p9)
}
  0x20   : > { %s4742_s20 = smov 128   ;;  %s4743_s21 = smov 8  }
  0x21   : > { %s4754_s6 = sld [smem:[#allocation12_spill]]  ;;  %s3740_s24 = scalar_lea.vmem %s277_s18, 128 }
  0x22   : > { %p3741_p13 = scmp.ne.s32.totalorder %s277_s18, %s3740_s24  ;;  %p3748_p10 = scmp.lt.s32.totalorder %s277_s18, %s277_s18 }
  0x23   : > { %p3749_p3 = scmp.lt.s32.totalorder %s3740_s24, %s3740_s24 }
  0x24   : > { %p3743_p0 = pnand %p3741_p13, %p3705_p12 }
  0x25   : > { %p3750_p7 = por %p3749_p3, %p3748_p10 }
  0x26   : > { %p3744_p5 = pneg %p3743_p0 }
  0x27   : > { %3599 = dma.hbm_to_vmem [thread:$0]  (!%p3955_p11), %s4754_s6, 2048, %s263_s15, [#allocation6], %s4742_s20, %s4742_s20, %s4743_s21  }
  0x28   : > { %p3751_p9 = pnand %p3750_p7, %p3744_p5 }
  0x2a   : > { %3754 = shalt.err (!%p3751_p9)
}
  0x2b   : > { %s4755_s7 = sld [smem:[#allocation13_spill]]  ;;  %s3981_s10 = sadd.s32 1, %s3851_s30  }
  0x2c   : > { %s110_s14 = sadd.s32 1, %s3847_s29  ;;  %s107_s15 = ssub.s32 %s3851_s30, %s3981_s10 }
  0x2d   : > { %p117_p12 = scmp.ne.s32.totalorder %s3847_s29, %s3843_s28  ;;  %p108_p13 = scmp.eq.s32.totalorder %s107_s15, 0 }
  0x2e   : > { %p118_p0 = scmp.eq.s32.totalorder %s3851_s30, 0  ;;  %p3613_p10 = scmp.lt.s32.totalorder %s3851_s30, 2 }
  0x2f   : > { %p3991_p5 = por %p231_p2, %p117_p12  ;;  %s317_s19 = sand.u32 1, %s3847_s29  }
  0x30   : > { %s3997_s17 = scalar_select %p108_p13, %s3847_s29, %s110_s14  }
  0x31   : > { %3602 = dma.hbm_to_vmem [thread:$0]  (!%p3955_p11), %s4755_s7, 128, %s277_s18, [#allocation6]  }
  0x32   : > { %s4756_s16 = scalar_select %p3991_p5, 1, 0 }
  0x33   : > { %p119_p3 = por %p118_p0, %p117_p12  ;;  %s3052_s22 = sshll.u32 %s317_s19, 7 }
  0x34   : > { %s3132_s18 = sshll.u32 %s3851_s30, 11  ;;  %s321_s26 = scalar_lea.vmem [#allocation2], %s3052_s22 }
  0x35   : > { %s4004_s25 = scalar_lea.hbm %s4736_s3, %s3132_s18  ;;  %s329_s15 = sshll.u32 %s321_s26, 4  ;;  %s4006_s15 = int_to_ptr.vmem [resolvable:$true] %s329_s15 }
  0x36   : > { %p4008_p2 = pnand %p3613_p10, %p119_p3  ;;  %s4012_s14 = scalar_lea.sflag [#allocation3], %s317_s19 }
  0x37   : > { %s3755_s21 = scalar_lea.hbm %s4004_s25, 2048  ;;  %s3760_s22 = scalar_lea.hbm %s4736_s3, 4096 }
  0x38   : > { %p3756_p11 = scmp.ne.s32.totalorder %s4004_s25, %s3755_s21  ;;  %p3757_p7 = pneg %p4008_p2 }
  0x39   : > { %p3761_p13 = scmp.lt.s32.totalorder %s4004_s25, %s4736_s3  ;;  %p3762_p0 = scmp.lt.s32.totalorder %s3760_s22, %s3755_s21 }
  0x3a   : > { %p3758_p9 = pnand %p3757_p7, %p3756_p11 }
  0x3b   : > { %p3763_p10 = por %p3762_p0, %p3761_p13 }
  0x3c   : > { %p3759_p12 = pneg %p3758_p9 }
  0x3e   : > { %p3764_p3 = pnand %p3763_p10, %p3759_p12 }
  0x40   : > { %3767 = shalt.err (!%p3764_p3)
}
  0x41   : > { %s3768_s19 = scalar_lea.vmem %s4006_s15, 2048  ;;  %s3857_s6 = smov [#allocation2]  }
  0x42   : > { %p3769_p1 = scmp.ne.s32.totalorder %s4006_s15, %s3768_s19  ;;  %s3773_s7 = sshll.u32 %s3857_s6, 4  ;;  %s3774_s7 = int_to_ptr.vmem [resolvable:$false] %s3773_s7 }
  0x43   : > { %s3775_s18 = scalar_lea.vmem %s3774_s7, 4096  ;;  %p3776_p9 = scmp.lt.s32.totalorder %s4006_s15, %s3774_s7 }
  0x44   : > { %p3771_p6 = pnand %p3769_p1, %p3757_p7  ;;  %p3777_p5 = scmp.lt.s32.totalorder %s3775_s18, %s3768_s19 }
  0x46   : > { %p3772_p11 = pneg %p3771_p6  ;;  %p3778_p4 = por %p3777_p5, %p3776_p9 }
  0x48   : > { %p3779_p8 = pnand %p3778_p4, %p3772_p11 }
  0x4a   : > { %3782 = shalt.err (!%p3779_p8)
}
  0x4b   : > { %s4758_s21 = smov 8   ;;  %s4759_s23 = smov 128  }
  0x4c   : > { %3606 = dma.hbm_to_vmem [thread:$0]  (!%p4008_p2), %s4004_s25, 2048, %s4006_s15, %s4012_s14, %s4759_s23, %s4759_s23, %s4758_s21  }
  0x4d   : > { %p4760_p1 = scmp.ne.s32.totalorder %s4752_s13, 0 }
  0x4e   : > { %s4039_s6 = sand.u32 (!%p4760_p1), 1, %s3843_s28   ;;  %p4761_p4 = scmp.ne.s32.totalorder (!%p4760_p1), %s4750_s11, 0 }
  0x4f   : > { %341 = sbr.rel (%p4760_p1) target bundleno = 933 (0x3a5), region = 52  ;;  %s3057_s7 = sshll.u32 (!%p4760_p1), %s4039_s6, 7 }
  0x50   : > { %s344_s22 = scalar_lea.sflag (!%p4760_p1), [#allocation3], %s4039_s6  ;;  %s4045_s20 = scalar_lea.vmem (!%p4760_p1), [#allocation2], %s3057_s7 }
  0x54   : > { %3826 = dma.done.wait (%p4761_p4), %s344_s22, 2048  }
  0x55   : > { %3828 = vsyncadd (%p4761_p4), %s344_s22, 4294965248  ;;  %p4762_p6 = scmp.eq.s32.totalorder %s3927_s9, 0 }
  0x57   : > { %3830 = dma.done.wait (%p4762_p6), [#allocation6], 2176   ;;  %p4763_p8 = pmov %p4762_p6 }
  0x58   : > { %s3061_s13 = sshll.u32 %s3927_s9, 3  ;;  %v461_v8 = vld [vmem:[%s4045_s20 + $0x50] sm:$0xff]  ;;  %vm499_vm0 = vcmask 261120   ;;  %v451_v9 = vld [vmem:[%s4045_s20] sm:$0xff]  ;;  %v462_v11 = vld [vmem:[%s4045_s20 + $0x58] sm:$0xff]  ;;  %vm1199_vm1 = vcmask 1040384  }
  0x59   : > { %3832 = vsyncadd (%p4763_p8), [#allocation6], 4294965120  ;;  %p407_p5 = scmp.lt.s32.totalorder %s3061_s13, 15  ;;  %v452_v13 = vld [vmem:[%s4045_s20 + $0x8] sm:$0xff]  ;;  %3363 = vmatprep.mubr.msk.f32.mxu1 %vm499_vm0, %v461_v8  ;;  %3308 = vmatprep.mubr.msk.f32.mxu0 %vm499_vm0, %v451_v9  ;;  %v465_v20 = vld [vmem:[%s4045_s20 + $0x70] sm:$0xff]  ;;  %vm1150_vm2 = vcmask 72704  }
  0x5a   : > { %v453_v21 = vld [vmem:[%s4045_s20 + $0x10] sm:$0xff]  ;;  %v466_v23 = vld [vmem:[%s4045_s20 + $0x78] sm:$0xff]  ;;  %v1361_v29 = vld [vmem:[%s4738_s5 + $0x68] sm:$0xff]  ;;  %vm1525_vm3 = vcmask 130048   ;;  %p4764_p7 = scmp.ne.s32.totalorder %s4756_s16, 0 }
  0x5b   : > { %s4772_s13 = smov (!%p407_p5, %s3061_s13), 15  ;;  %v1363_v24 = vld [vmem:[%s4738_s5 + $0x78] sm:$0xff]  ;;  %v1362_v27 = vld [vmem:[%s4738_s5 + $0x70] sm:$0xff]  ;;  %v1360_v31 = vld [vmem:[%s4738_s5 + $0x60] sm:$0xff] }
  0x5c   : > { %s3133_s25 = sshll.u32 %s4772_s13, 5  ;;  %v454_v25 = vld [vmem:[%s4045_s20 + $0x18] sm:$0xff]  ;;  %v455_v32 = vld [vmem:[%s4045_s20 + $0x20] sm:$0xff]  ;;  %v456_v35 = vld [vmem:[%s4045_s20 + $0x28] sm:$0xff]  ;;  %s3134_s15 = sshll.u32 %s4772_s13, 4 }
  0x5d   : > { %s4062_s24 = scalar_lea.vmem %s4733_s0, %s3133_s25  ;;  %v1359_v34 = vld [vmem:[%s4738_s5 + $0x58] sm:$0xff]  ;;  %v1358_v37 = vld [vmem:[%s4738_s5 + $0x50] sm:$0xff]  ;;  %v1357_v39 = vld [vmem:[%s4738_s5 + $0x48] sm:$0xff]  ;;  %s4174_s18 = scalar_lea.vmem %s4734_s1, %s3134_s15 }
  0x5e   : > { %v470_v0 = vld [vmem:[%s4062_s24 + $0x18] sm:$0xff]  ;;  %v469_v2 = vld [vmem:[%s4062_s24 + $0x10] sm:$0xff]  ;;  %v468_v4 = vld [vmem:[%s4062_s24 + $0x8] sm:$0xff]  ;;  %s4224_s26 = scalar_lea.vmem %s4735_s2, %s3134_s15  ;;  %s4617_s13 = scalar_lea.vmem [#allocation8], %s3057_s7 }
  0x5f   : > { %v490_v1 = vld [vmem:[%s4062_s24 + $0xb8] sm:$0xff]  ;;  %3300 = vmatprep.subr.mxu0 %v470_v0  ;;  %v489_v3 = vld [vmem:[%s4062_s24 + $0xb0] sm:$0xff]  ;;  %v488_v5 = vld [vmem:[%s4062_s24 + $0xa8] sm:$0xff]  ;;  %s3137_s7 = sshll.u32 %s3927_s9, 11  ;;  %s2919_s15 = sshll.u32 %s4617_s13, 4  ;;  %s4688_s15 = int_to_ptr.vmem [resolvable:$true] %s2919_s15 }
  0x60   : > { %3355 = vmatprep.subr.mxu1 %v490_v1  ;;  %3301 = vmatpush3.msra.mxu0 %v470_v0  ;;  %v467_v6 = vld [vmem:[%s4062_s24] sm:$0xff]  ;;  %v474_v10 = vld [vmem:[%s4062_s24 + $0x38] sm:$0xff]  ;;  %v473_v14 = vld [vmem:[%s4062_s24 + $0x30] sm:$0xff]  ;;  %s4686_s21 = scalar_lea.hbm %s4741_s8, %s3137_s7  ;;  %s2905_s9 = scalar_lea.sflag [#allocation4], %s4039_s6 }
  0x61   : > { %3356 = vmatpush3.msra.mxu1 %v490_v1  ;;  %3302 = vmatprep.subr.mxu0 %v469_v2  ;;  %v487_v7 = vld [vmem:[%s4062_s24 + $0xa0] sm:$0xff]  ;;  %v498_v12 = vld [vmem:[%s4062_s24 + $0xf8] sm:$0xff]  ;;  %v497_v15 = vld [vmem:[%s4062_s24 + $0xf0] sm:$0xff]  ;;  %s3783_s23 = scalar_lea.vmem %s4688_s15, 2048 }
  0x62   : > { %3357 = vmatprep.subr.mxu1 %v489_v3  ;;  %3303 = vmatpush3.msra.mxu0 %v469_v2  ;;  %v472_v16 = vld [vmem:[%s4062_s24 + $0x28] sm:$0xff]  ;;  %v471_v18 = vld [vmem:[%s4062_s24 + $0x20] sm:$0xff]  ;;  %v478_v22 = vld [vmem:[%s4062_s24 + $0x58] sm:$0xff]  ;;  %p3784_p2 = scmp.ne.s32.totalorder %s4688_s15, %s3783_s23 }
  0x63   : > { %3358 = vmatpush3.msra.mxu1 %v489_v3  ;;  %3304 = vmatprep.subr.mxu0 %v468_v4  ;;  %v496_v17 = vld [vmem:[%s4062_s24 + $0xe8] sm:$0xff]  ;;  %v495_v19 = vld [vmem:[%s4062_s24 + $0xe0] sm:$0xff]  ;;  %v477_v26 = vld [vmem:[%s4062_s24 + $0x50] sm:$0xff] }
  0x64   : > { %3359 = vmatprep.subr.mxu1 %v488_v5  ;;  %3305 = vmatpush3.msra.mxu0 %v468_v4  ;;  %v476_v28 = vld [vmem:[%s4062_s24 + $0x48] sm:$0xff]  ;;  %v475_v30 = vld [vmem:[%s4062_s24 + $0x40] sm:$0xff]  ;;  %v482_v33 = vld [vmem:[%s4062_s24 + $0x78] sm:$0xff]  ;;  %p3785_p12 = pnand %p3784_p2, %p4764_p7 }
  0x65   : > { %3360 = vmatpush3.msra.mxu1 %v488_v5  ;;  %3306 = vmatprep.subr.mxu0 %v467_v6  ;;  %v481_v36 = vld [vmem:[%s4062_s24 + $0x70] sm:$0xff]  ;;  %v480_v38 = vld [vmem:[%s4062_s24 + $0x68] sm:$0xff]  ;;  %v479_v40 = vld [vmem:[%s4062_s24 + $0x60] sm:$0xff] }
  0x66   : > { %3361 = vmatprep.subr.mxu1 %v487_v7  ;;  %3307 = vmatpush3.msra.mxu0 %v467_v6  ;;  %v1356_v41 = vld [vmem:[%s4738_s5 + $0x40] sm:$0xff]  ;;  %v457_v42 = vld [vmem:[%s4045_s20 + $0x30] sm:$0xff]  ;;  %v486_v43 = vld [vmem:[%s4062_s24 + $0x98] sm:$0xff]  ;;  %p3786_p13 = pneg %p3785_p12 }
  0x67   : > { %3362 = vmatpush3.msra.mxu1 %v487_v7  ;;  %3311 = vmatprep.subr.mxu0 %v474_v10  ;;  %v1355_v44 = vld [vmem:[%s4738_s5 + $0x38] sm:$0xff]  ;;  %v485_v46 = vld [vmem:[%s4062_s24 + $0x90] sm:$0xff]  ;;  %v484_v48 = vld [vmem:[%s4062_s24 + $0x88] sm:$0xff] }
  0x68   : > { %3364 = vmatmul.mubr.msk.f32.vlgmr.msra.gmra.mxu1 %vm499_vm0, %v462_v11  ;;  %3377 = vmatprep.subr.mxu1 %v498_v12  ;;  %v458_v45 = vld [vmem:[%s4045_s20 + $0x38] sm:$0xff]  ;;  %v1354_v47 = vld [vmem:[%s4738_s5 + $0x30] sm:$0xff]  ;;  %v1353_v49 = vld [vmem:[%s4738_s5 + $0x28] sm:$0xff] }
  0x69   : > { %3309 = vmatmul.mubr.msk.f32.vlgmr.msra.gmra.mxu0 %vm499_vm0, %v452_v13  ;;  %3378 = vmatpush3.msra.mxu1 %v498_v12  ;;  %v483_v50 = vld [vmem:[%s4062_s24 + $0x80] sm:$0xff]  ;;  %v460_v53 = vld [vmem:[%s4045_s20 + $0x48] sm:$0xff]  ;;  %v494_v54 = vld [vmem:[%s4062_s24 + $0xd8] sm:$0xff] }
  0x6a   : > { %3312 = vmatpush3.msra.mxu0 %v474_v10  ;;  %3379 = vmatprep.subr.mxu1 %v497_v15  ;;  %v1352_v51 = vld [vmem:[%s4738_s5 + $0x20] sm:$0xff]  ;;  %v1351_v55 = vld [vmem:[%s4738_s5 + $0x18] sm:$0xff]  ;;  %v493_v56 = vld [vmem:[%s4062_s24 + $0xd0] sm:$0xff] }
  0x6b   : > { %3313 = vmatprep.subr.mxu0 %v473_v14  ;;  %3380 = vmatpush3.msra.mxu1 %v497_v15  ;;  %v459_v52 = vld [vmem:[%s4045_s20 + $0x40] sm:$0xff]  ;;  %v1350_v57 = vld [vmem:[%s4738_s5 + $0x10] sm:$0xff]  ;;  %v492_v58 = vld [vmem:[%s4062_s24 + $0xc8] sm:$0xff] }
  0x6c   : > { %3314 = vmatpush3.msra.mxu0 %v473_v14  ;;  %3381 = vmatprep.subr.mxu1 %v496_v17  ;;  %v1349_v59 = vld [vmem:[%s4738_s5 + $0x8] sm:$0xff]  ;;  %v491_v60 = vld [vmem:[%s4062_s24 + $0xc0] sm:$0xff]  ;;  %v437_v2 = vld [vmem:[%s4174_s18 + $0x10] sm:$0xff] }
  0x6d   : > { %3315 = vmatprep.subr.mxu0 %v472_v16  ;;  %3382 = vmatpush3.msra.mxu1 %v496_v17  ;;  %v1348_v61 = vld [vmem:[%s4738_s5] sm:$0xff]  ;;  %v464_v0 = vld [vmem:[%s4045_s20 + $0x68] sm:$0xff]  ;;  %v438_v3 = vld [vmem:[%s4174_s18 + $0x18] sm:$0xff] }
  0x6e   : > { %3316 = vmatpush3.msra.mxu0 %v472_v16  ;;  %3383 = vmatprep.subr.mxu1 %v495_v19  ;;  %v463_v62 = vld [vmem:[%s4045_s20 + $0x60] sm:$0xff]  ;;  %v436_v1 = vld [vmem:[%s4174_s18 + $0x8] sm:$0xff]  ;;  %v441_v6 = vld [vmem:[%s4174_s18 + $0x30] sm:$0xff]  ;;  %s3858_s20 = smov [#allocation8]  }
  0x6f   : > { %3317 = vmatprep.subr.mxu0 %v471_v18  ;;  %3384 = vmatpush3.msra.mxu1 %v495_v19  ;;  %v435_v63 = vld [vmem:[%s4174_s18] sm:$0xff]  ;;  %v440_v5 = vld [vmem:[%s4174_s18 + $0x28] sm:$0xff]  ;;  %v442_v7 = vld [vmem:[%s4174_s18 + $0x38] sm:$0xff]  ;;  %s3787_s24 = sshll.u32 %s3858_s20, 4  ;;  %s3788_s24 = int_to_ptr.vmem [resolvable:$false] %s3787_s24 }
  0x70   : > { %3318 = vmatpush3.msra.mxu0 %v471_v18  ;;  %3385 = vmatprep.mubr.msk.f32.mxu1 %vm499_vm0, %v465_v20  ;;  %v439_v4 = vld [vmem:[%s4174_s18 + $0x20] sm:$0xff]  ;;  %v444_v9 = vld [vmem:[%s4174_s18 + $0x48] sm:$0xff]  ;;  %v445_v10 = vld [vmem:[%s4174_s18 + $0x50] sm:$0xff]  ;;  %s3789_s22 = scalar_lea.vmem %s3788_s24, 4096  ;;  %p3790_p0 = scmp.lt.s32.totalorder %s4688_s15, %s3788_s24 }
  0x71   : > { %3319 = vmatprep.mubr.msk.f32.mxu0 %vm499_vm0, %v453_v21  ;;  %3322 = vmatprep.subr.mxu0 %v478_v22  ;;  %v443_v8 = vld [vmem:[%s4174_s18 + $0x40] sm:$0xff]  ;;  %v446_v11 = vld [vmem:[%s4174_s18 + $0x58] sm:$0xff]  ;;  %v448_v13 = vld [vmem:[%s4174_s18 + $0x68] sm:$0xff]  ;;  %p3791_p10 = scmp.lt.s32.totalorder %s3789_s22, %s3783_s23 }
  0x72   : > { %3386 = vmatmul.mubr.msk.f32.vlgmr.msra.gmra.mxu1 %vm499_vm0, %v466_v23  ;;  %3416 = vmatprep.subr.mxu1 %v1363_v24  ;;  %v447_v12 = vld [vmem:[%s4174_s18 + $0x60] sm:$0xff]  ;;  %v449_v14 = vld [vmem:[%s4174_s18 + $0x70] sm:$0xff]  ;;  %v1149_v15 = vld [vmem:[%s4737_s4 + $0x8] sm:$0x1] }
  0x73   : > { %3320 = vmatmul.mubr.msk.f32.vlgmr.msra.gmra.mxu0 %vm499_vm0, %v454_v25  ;;  %3417 = vmatpush3.msra.mxu1 %v1363_v24  ;;  %v450_v16 = vld [vmem:[%s4174_s18 + $0x78] sm:$0xff]  ;;  %v1148_v17 = vld [vmem:[%s4737_s4] sm:$0xff]  ;;  %p3792_p3 = por %p3791_p10, %p3790_p0 }
  0x74   : > { %3323 = vmatpush3.msra.mxu0 %v478_v22  ;;  %3418 = vmatprep.subr.mxu1 %v1362_v27 }
  0x75   : > { %3324 = vmatprep.subr.mxu0 %v477_v26  ;;  %3419 = vmatpush3.msra.mxu1 %v1362_v27  ;;  %p3793_p11 = pnand %p3792_p3, %p3786_p13 }
  0x76   : > { %3325 = vmatpush3.msra.mxu0 %v477_v26  ;;  %3420 = vmatprep.subr.mxu1 %v1361_v29 }
  0x77   : > { %3326 = vmatprep.subr.mxu0 %v476_v28  ;;  %3421 = vmatpush3.msra.mxu1 %v1361_v29 }
  0x78   : > { %3327 = vmatpush3.msra.mxu0 %v476_v28  ;;  %3422 = vmatprep.subr.mxu1 %v1360_v31 }
  0x79   : > { %3328 = vmatprep.subr.mxu0 %v475_v30  ;;  %3423 = vmatpush3.msra.mxu1 %v1360_v31 }
  0x7a   : > { %3329 = vmatpush3.msra.mxu0 %v475_v30  ;;  %3330 = vmatprep.mubr.msk.f32.mxu0 %vm499_vm0, %v455_v32 }
  0x7b   : > { %3333 = vmatprep.subr.mxu0 %v482_v33  ;;  %3424 = vmatprep.subr.mxu1 %v1359_v34 }
  0x7c   : > { %3331 = vmatmul.mubr.msk.f32.vlgmr.msra.gmra.mxu0 %vm499_vm0, %v456_v35  ;;  %3425 = vmatpush3.msra.mxu1 %v1359_v34 }
  0x7d   : > { %3334 = vmatpush3.msra.mxu0 %v482_v33  ;;  %3426 = vmatprep.subr.mxu1 %v1358_v37 }
  0x7e   : > { %3335 = vmatprep.subr.mxu0 %v481_v36  ;;  %3427 = vmatpush3.msra.mxu1 %v1358_v37  ;;  %v1509_v37 = vld [vmem:[%s4224_s26] sm:$0xff] }
  0x7f   : > { %3336 = vmatpush3.msra.mxu0 %v481_v36  ;;  %3428 = vmatprep.subr.mxu1 %v1357_v39 }
  0x80   : > { %3337 = vmatprep.subr.mxu0 %v480_v38  ;;  %3429 = vmatpush3.msra.mxu1 %v1357_v39 }
  0x81   : > { %3338 = vmatpush3.msra.mxu0 %v480_v38  ;;  %3430 = vmatprep.subr.mxu1 %v1356_v41 }
  0x82   : > { %3339 = vmatprep.subr.mxu0 %v479_v40  ;;  %3431 = vmatpush3.msra.mxu1 %v1356_v41  ;;  %v1511_v41 = vld [vmem:[%s4224_s26 + $0x10] sm:$0xff] }
  0x83   : > { %3340 = vmatpush3.msra.mxu0 %v479_v40  ;;  %3341 = vmatprep.mubr.msk.f32.mxu0 %vm499_vm0, %v457_v42  ;;  %v1510_v40 = vld [vmem:[%s4224_s26 + $0x8] sm:$0xff] }
  0x84   : > { %3344 = vmatprep.subr.mxu0 %v486_v43  ;;  %3432 = vmatprep.subr.mxu1 %v1355_v44 }
  0x85   : > { %3342 = vmatmul.mubr.msk.f32.vlgmr.msra.gmra.mxu0 %vm499_vm0, %v458_v45  ;;  %3433 = vmatpush3.msra.mxu1 %v1355_v44  ;;  %v1512_v44 = vld [vmem:[%s4224_s26 + $0x18] sm:$0xff]  ;;  %v1513_v45 = vld [vmem:[%s4224_s26 + $0x20] sm:$0xff] }
  0x86   : > { %3345 = vmatpush3.msra.mxu0 %v486_v43  ;;  %3434 = vmatprep.subr.mxu1 %v1354_v47 }
  0x87   : > { %3346 = vmatprep.subr.mxu0 %v485_v46  ;;  %3435 = vmatpush3.msra.mxu1 %v1354_v47 }
  0x88   : > { %3347 = vmatpush3.msra.mxu0 %v485_v46  ;;  %3436 = vmatprep.subr.mxu1 %v1353_v49 }
  0x89   : > { %3348 = vmatprep.subr.mxu0 %v484_v48  ;;  %3437 = vmatpush3.msra.mxu1 %v1353_v49  ;;  %v1515_v49 = vld [vmem:[%s4224_s26 + $0x30] sm:$0xff] }
  0x8a   : > { %3349 = vmatpush3.msra.mxu0 %v484_v48  ;;  %3438 = vmatprep.subr.mxu1 %v1352_v51  ;;  %v1514_v48 = vld [vmem:[%s4224_s26 + $0x28] sm:$0xff] }
  0x8b   : > { %3350 = vmatprep.subr.mxu0 %v483_v50  ;;  %3352 = vmatprep.mubr.msk.f32.mxu0 %vm499_vm0, %v459_v52  ;;  %v1516_v52 = vld [vmem:[%s4224_s26 + $0x38] sm:$0xff] }
  0x8c   : > { %3351 = vmatpush3.msra.mxu0 %v483_v50  ;;  %3439 = vmatpush3.msra.mxu1 %v1352_v51 }
  0x8d   : > { %3353 = vmatmul.mubr.msk.f32.vlgmr.msra.gmra.mxu0 %vm499_vm0, %v460_v53  ;;  %3366 = vmatprep.subr.mxu0 %v494_v54  ;;  %v1517_v53 = vld [vmem:[%s4224_s26 + $0x40] sm:$0xff] }
  0x8e   : > { %3440 = vmatprep.subr.mxu1 %v1351_v55  ;;  %3367 = vmatpush3.msra.mxu0 %v494_v54 }
  0x8f   : > { %3441 = vmatpush3.msra.mxu1 %v1351_v55  ;;  %3368 = vmatprep.subr.mxu0 %v493_v56 }
  0x90   : > { %3442 = vmatprep.subr.mxu1 %v1350_v57  ;;  %3369 = vmatpush3.msra.mxu0 %v493_v56  ;;  %v1518_v56 = vld [vmem:[%s4224_s26 + $0x48] sm:$0xff] }
  0x91   : > { %3443 = vmatpush3.msra.mxu1 %v1350_v57  ;;  %3370 = vmatprep.subr.mxu0 %v492_v58  ;;  %v1519_v57 = vld [vmem:[%s4224_s26 + $0x50] sm:$0xff] }
  0x92   : > { %3444 = vmatprep.subr.mxu1 %v1349_v59  ;;  %3371 = vmatpush3.msra.mxu0 %v492_v58 }
  0x93   : > { %3445 = vmatpush3.msra.mxu1 %v1349_v59  ;;  %3372 = vmatprep.subr.mxu0 %v491_v60  ;;  %v1520_v59 = vld [vmem:[%s4224_s26 + $0x58] sm:$0xff] }
  0x94   : > { %3446 = vmatprep.subr.mxu1 %v1348_v61  ;;  %3373 = vmatpush3.msra.mxu0 %v491_v60  ;;  %v1521_v60 = vld [vmem:[%s4224_s26 + $0x60] sm:$0xff] }
  0x95   : > { %3374 = vmatprep.mubr.msk.f32.mxu0 %vm499_vm0, %v463_v62  ;;  %3447 = vmatpush3.msra.mxu1 %v1348_v61  ;;  %v1522_v62 = vld [vmem:[%s4224_s26 + $0x68] sm:$0xff] }
  0x96   : > { %3448 = vmatprep.mubr.f32.mxu1 %v435_v63  ;;  %3375 = vmatmul.mubr.msk.f32.vlgmr.msra.gmra.mxu0 %vm499_vm0, %v464_v0  ;;  %v1523_v63 = vld [vmem:[%s4224_s26 + $0x70] sm:$0xff] }
  0x97   : > { %3449 = vmatmul.mubr.f32.vlgmr.msra.gmra.mxu1 %v436_v1  ;;  %3388 = vmatprep.subr.msk.mxu0 %vm1199_vm1, %v1149_v15  ;;  %v1524_v1 = vld [vmem:[%s4224_s26 + $0x78] sm:$0xff] }
  0x98   : > { %3451 = vmatprep.mubr.f32.mxu1 %v437_v2  ;;  %3389 = vmatpush3.msk.msra.mxu0 %vm1199_vm1, %v1149_v15  ;;  %v2474_v2 = vld [vmem:[#allocation5 + $0x78] sm:$0xff]  ;;  %v2461_v15 = vld [vmem:[#allocation5 + $0x10] sm:$0xff] }
  0x99   : > { %3390 = vmatprep.subr.mxu0 %v1148_v17  ;;  %3528 = vmatprep.subr.mxu1 %v2474_v2 }
  0x9a   : > { %3391 = vmatpush3.msra.mxu0 %v1148_v17  ;;  %3529 = vmatpush3.msra.mxu1 %v2474_v2  ;;  %v2459_v17 = vld [vmem:[#allocation5] sm:$0xff] }
  0x9b   : > { %3452 = vmatmul.mubr.f32.gmra.mxu1 %v438_v3  ;;  %v2473_v3 = vld [vmem:[#allocation5 + $0x70] sm:$0xff] }
  0x9c   : > { %3454 = vmatprep.mubr.f32.mxu1 %v439_v4  ;;  %3530 = vmatprep.subr.mxu1 %v2473_v3  ;;  %v2472_v4 = vld [vmem:[#allocation5 + $0x68] sm:$0xff] }
  0x9d   : > { %3531 = vmatpush3.msra.mxu1 %v2473_v3 }
  0x9e   : > { %3532 = vmatprep.subr.mxu1 %v2472_v4 }
  0x9f   : > { %3455 = vmatmul.mubr.f32.gmra.mxu1 %v440_v5  ;;  %v2471_v5 = vld [vmem:[#allocation5 + $0x60] sm:$0xff] }
  0xa0   : > { %3457 = vmatprep.mubr.f32.mxu1 %v441_v6  ;;  %3533 = vmatpush3.msra.mxu1 %v2472_v4  ;;  %v2470_v6 = vld [vmem:[#allocation5 + $0x58] sm:$0xff] }
  0xa1   : > { %3534 = vmatprep.subr.mxu1 %v2471_v5 }
  0xa2   : > { %3535 = vmatpush3.msra.mxu1 %v2471_v5 }
  0xa3   : > { %3458 = vmatmul.mubr.f32.gmra.mxu1 %v442_v7  ;;  %3536 = vmatprep.subr.mxu1 %v2470_v6  ;;  %v2469_v7 = vld [vmem:[#allocation5 + $0x50] sm:$0xff] }
  0xa4   : > { %3460 = vmatprep.mubr.f32.mxu1 %v443_v8  ;;  %3537 = vmatpush3.msra.mxu1 %v2470_v6  ;;  %v2468_v8 = vld [vmem:[#allocation5 + $0x48] sm:$0xff] }
  0xa5   : > { %3538 = vmatprep.subr.mxu1 %v2469_v7 }
  0xa6   : > { %3539 = vmatpush3.msra.mxu1 %v2469_v7 }
  0xa7   : > { %3461 = vmatmul.mubr.f32.gmra.mxu1 %v444_v9  ;;  %3540 = vmatprep.subr.mxu1 %v2468_v8  ;;  %v2467_v9 = vld [vmem:[#allocation5 + $0x40] sm:$0xff] }
  0xa8   : > { %3463 = vmatprep.mubr.f32.mxu1 %v445_v10  ;;  %3541 = vmatpush3.msra.mxu1 %v2468_v8  ;;  %v2466_v10 = vld [vmem:[#allocation5 + $0x38] sm:$0xff] }
  0xa9   : > { %3542 = vmatprep.subr.mxu1 %v2467_v9 }
  0xaa   : > { %3543 = vmatpush3.msra.mxu1 %v2467_v9 }
  0xab   : > { %3464 = vmatmul.mubr.f32.gmra.mxu1 %v446_v11  ;;  %3544 = vmatprep.subr.mxu1 %v2466_v10  ;;  %v2465_v11 = vld [vmem:[#allocation5 + $0x30] sm:$0xff] }
  0xac   : > { %3466 = vmatprep.mubr.f32.mxu1 %v447_v12  ;;  %3545 = vmatpush3.msra.mxu1 %v2466_v10  ;;  %v2464_v12 = vld [vmem:[#allocation5 + $0x28] sm:$0xff] }
  0xad   : > { %3546 = vmatprep.subr.mxu1 %v2465_v11 }
  0xae   : > { %3547 = vmatpush3.msra.mxu1 %v2465_v11 }
  0xaf   : > { %3467 = vmatmul.mubr.f32.gmra.mxu1 %v448_v13  ;;  %3548 = vmatprep.subr.mxu1 %v2464_v12  ;;  %v2463_v13 = vld [vmem:[#allocation5 + $0x20] sm:$0xff] }
  0xb0   : > { %3469 = vmatprep.mubr.f32.mxu1 %v449_v14  ;;  %3549 = vmatpush3.msra.mxu1 %v2464_v12  ;;  %v2462_v14 = vld [vmem:[#allocation5 + $0x18] sm:$0xff] }
  0xb1   : > { %3550 = vmatprep.subr.mxu1 %v2463_v13 }
  0xb2   : > { %3551 = vmatpush3.msra.mxu1 %v2463_v13 }
  0xb3   : > { %3470 = vmatmul.mubr.f32.gmra.mxu1 %v450_v16  ;;  %3552 = vmatprep.subr.mxu1 %v2462_v14  ;;  %v2460_v16 = vld [vmem:[#allocation5 + $0x8] sm:$0xff] }
  0xb4   : > { %3553 = vmatpush3.msra.mxu1 %v2462_v14 }
  0xb5   : > { %3554 = vmatprep.subr.mxu1 %v2461_v15 }
  0xb6   : > { %3555 = vmatpush3.msra.mxu1 %v2461_v15 }
  0xb7   : > { %3556 = vmatprep.subr.mxu1 %v2460_v16 }
  0xb8   : > { %3557 = vmatpush3.msra.mxu1 %v2460_v16 }
  0xb9   : > { %3558 = vmatprep.subr.mxu1 %v2459_v17 }
  0xba   : > { %3559 = vmatpush3.msra.mxu1 %v2459_v17 }
 0x128   : > { %v3365_v26 = vpop.f32.mrf.mxu1 }
 0x129   : > { %v3310_v18 = vpop.f32.mrf.mxu0 }
 0x12a   : > { %v977_v28 = vpop.f32.mrf.mxu1 }
 0x12b   : > { %v572_v19 = vpop.f32.mrf.mxu0 }
 0x12c   : > { %3392 = vmatprep.mubr.msk.f32.mxu0 %vm1150_vm2, %v572_v19 }
 0x12d   : > { %3393 = vmatmul.mubr.msk.f32.vlgmr.msra.gmra.mxu0 %vm1150_vm2, %v3310_v18 }
 0x132   : > { %v3387_v30 = vpop.f32.mrf.mxu1 }
 0x133   : > { %v3321_v20 = vpop.f32.mrf.mxu0 }
 0x134   : > { %v1139_v31 = vpop.f32.mrf.mxu1 }
 0x135   : > { %v653_v21 = vpop.f32.mrf.mxu0 }
 0x136   : > { %3395 = vmatprep.mubr.msk.f32.mxu0 %vm1150_vm2, %v653_v21 }
 0x137   : > { %3396 = vmatmul.mubr.msk.f32.gmra.mxu0 %vm1150_vm2, %v3321_v20 }
 0x13c   : > { %v3332_v22 = vpop.f32.mrf.mxu0 }
 0x13e   : > { %v734_v23 = vpop.f32.mrf.mxu0 }
 0x13f   : > { %3398 = vmatprep.mubr.msk.f32.mxu0 %vm1150_vm2, %v734_v23 }
 0x140   : > { %3399 = vmatmul.mubr.msk.f32.gmra.mxu0 %vm1150_vm2, %v3332_v22 }
 0x145   : > { %v3343_v24 = vpop.f32.mrf.mxu0 }
 0x147   : > { %v815_v25 = vpop.f32.mrf.mxu0 }
 0x148   : > { %3401 = vmatprep.mubr.msk.f32.mxu0 %vm1150_vm2, %v815_v25 }
 0x149   : > { %3402 = vmatmul.mubr.msk.f32.gmra.mxu0 %vm1150_vm2, %v3343_v24 }
 0x14d   : > { %v3354_v27 = vpop.f32.mrf.mxu0 }
 0x14f   : > { %v896_v29 = vpop.f32.mrf.mxu0 }
 0x150   : > { %3404 = vmatprep.mubr.msk.f32.mxu0 %vm1150_vm2, %v896_v29 }
 0x151   : > { %3405 = vmatmul.mubr.msk.f32.gmra.mxu0 %vm1150_vm2, %v3354_v27 }
 0x152   : > { %3407 = vmatprep.mubr.msk.f32.mxu0 %vm1150_vm2, %v977_v28 }
 0x155   : > { %3408 = vmatmul.mubr.msk.f32.gmra.mxu0 %vm1150_vm2, %v3365_v26 }
 0x156   : > { %v3376_v32 = vpop.f32.mrf.mxu0 }
 0x157   : > { %v3450_v33 = vpop.f32.mrf.mxu1 }
 0x158   : > { %3472 = vmatprep.subr.mxu0 %v3450_v33  ;;  %v1058_v34 = vpop.f32.mrf.mxu0 }
 0x159   : > { %v1430_v35 = vpop.f32.mrf.mxu1  ;;  %3473 = vmatpush3.msra.mxu0 %v3450_v33  ;;  %3410 = vmatprep.mubr.msk.f32.mxu0 %vm1150_vm2, %v1058_v34  ;;  %v4273_v34 = vld [vmem:[#allocation7] ss:$0 sm:$0xff] }
 0x15a   : > { %3474 = vmatprep.subr.mxu0 %v1430_v35  ;;  %3411 = vmatmul.mubr.msk.f32.gmra.mxu0 %vm1150_vm2, %v3376_v32 }
 0x15b   : > { %v3453_v36 = vpop.f32.mrf.mxu1  ;;  %3475 = vmatpush3.msra.mxu0 %v1430_v35  ;;  %3413 = vmatprep.mubr.msk.f32.mxu0 %vm1150_vm2, %v1139_v31 }
 0x15c   : > { %3479 = vmatprep.subr.mxu0 %v3453_v36 }
 0x15d   : > { %v1440_v38 = vpop.f32.mrf.mxu1 }
 0x15e   : > { %3414 = vmatmul.mubr.msk.f32.gmra.mxu0 %vm1150_vm2, %v3387_v30 }
 0x15f   : > { %v3456_v39 = vpop.f32.mrf.mxu1  ;;  %3476 = vmatprep.mubr.msk.f32.mxu0 %vm1525_vm3, %v1509_v37 }
 0x161   : > { %v1450_v42 = vpop.f32.mrf.mxu1 }
 0x162   : > { %3477 = vmatmul.mubr.msk.f32.vlgmr.msra.gmra.mxu0 %vm1525_vm3, %v1510_v40 }
 0x163   : > { %v3459_v43 = vpop.f32.mrf.mxu1  ;;  %3480 = vmatpush3.msra.mxu0 %v3453_v36  ;;  %3483 = vmatprep.mubr.msk.f32.mxu0 %vm1525_vm3, %v1511_v41 }
 0x164   : > { %3481 = vmatprep.subr.mxu0 %v1440_v38 }
 0x165   : > { %v1460_v46 = vpop.f32.mrf.mxu1  ;;  %3482 = vmatpush3.msra.mxu0 %v1440_v38 }
 0x166   : > { %3484 = vmatmul.mubr.msk.f32.vlgmr.msra.gmra.mxu0 %vm1525_vm3, %v1512_v44  ;;  %3486 = vmatprep.subr.mxu0 %v3456_v39 }
 0x167   : > { %v3462_v47 = vpop.f32.mrf.mxu1  ;;  %3487 = vmatpush3.msra.mxu0 %v3456_v39  ;;  %3490 = vmatprep.mubr.msk.f32.mxu0 %vm1525_vm3, %v1513_v45 }
 0x168   : > { %3488 = vmatprep.subr.mxu0 %v1450_v42 }
 0x169   : > { %v1470_v50 = vpop.f32.mrf.mxu1  ;;  %3489 = vmatpush3.msra.mxu0 %v1450_v42 }
 0x16a   : > { %3491 = vmatmul.mubr.msk.f32.vlgmr.msra.gmra.mxu0 %vm1525_vm3, %v1514_v48  ;;  %3493 = vmatprep.subr.mxu0 %v3459_v43 }
 0x16b   : > { %v3465_v51 = vpop.f32.mrf.mxu1  ;;  %3494 = vmatpush3.msra.mxu0 %v3459_v43  ;;  %3497 = vmatprep.mubr.msk.f32.mxu0 %vm1525_vm3, %v1515_v49 }
 0x16c   : > { %3495 = vmatprep.subr.mxu0 %v1460_v46 }
 0x16d   : > { %v1480_v54 = vpop.f32.mrf.mxu1  ;;  %3496 = vmatpush3.msra.mxu0 %v1460_v46 }
 0x16e   : > { %3498 = vmatmul.mubr.msk.f32.vlgmr.msra.gmra.mxu0 %vm1525_vm3, %v1516_v52  ;;  %3500 = vmatprep.subr.mxu0 %v3462_v47 }
 0x16f   : > { %v3468_v55 = vpop.f32.mrf.mxu1  ;;  %3501 = vmatpush3.msra.mxu0 %v3462_v47  ;;  %3504 = vmatprep.mubr.msk.f32.mxu0 %vm1525_vm3, %v1517_v53 }
 0x170   : > { %3502 = vmatprep.subr.mxu0 %v1470_v50 }
 0x171   : > { %3503 = vmatpush3.msra.mxu0 %v1470_v50  ;;  %v1490_v58 = vpop.f32.mrf.mxu1 }
 0x172   : > { %3505 = vmatmul.mubr.msk.f32.vlgmr.msra.gmra.mxu0 %vm1525_vm3, %v1518_v56  ;;  %3507 = vmatprep.subr.mxu0 %v3465_v51 }
 0x173   : > { %3508 = vmatpush3.msra.mxu0 %v3465_v51  ;;  %3511 = vmatprep.mubr.msk.f32.mxu0 %vm1525_vm3, %v1519_v57  ;;  %v3471_v61 = vpop.f32.mrf.mxu1 }
 0x174   : > { %3509 = vmatprep.subr.mxu0 %v1480_v54 }
 0x175   : > { %3510 = vmatpush3.msra.mxu0 %v1480_v54  ;;  %v1500_v0 = vpop.f32.mrf.mxu1 }
 0x176   : > { %3512 = vmatmul.mubr.msk.f32.vlgmr.msra.gmra.mxu0 %vm1525_vm3, %v1520_v59  ;;  %3514 = vmatprep.subr.mxu0 %v3468_v55 }
 0x177   : > { %3515 = vmatpush3.msra.mxu0 %v3468_v55  ;;  %3518 = vmatprep.mubr.msk.f32.mxu0 %vm1525_vm3, %v1521_v60 }
 0x178   : > { %3516 = vmatprep.subr.mxu0 %v1490_v58 }
 0x179   : > { %3517 = vmatpush3.msra.mxu0 %v1490_v58 }
 0x17a   : > { %3519 = vmatmul.mubr.msk.f32.vlgmr.msra.gmra.mxu0 %vm1525_vm3, %v1522_v62  ;;  %3521 = vmatprep.subr.mxu0 %v3471_v61 }
 0x17b   : > { %3522 = vmatpush3.msra.mxu0 %v3471_v61  ;;  %3525 = vmatprep.mubr.msk.f32.mxu0 %vm1525_vm3, %v1523_v63 }
 0x17c   : > { %3523 = vmatprep.subr.mxu0 %v1500_v0 }
 0x17d   : > { %3524 = vmatpush3.msra.mxu0 %v1500_v0 }
 0x17e   : > { %3526 = vmatmul.mubr.msk.f32.vlgmr.msra.gmra.mxu0 %vm1525_vm3, %v1524_v1 }
 0x1ed   : > { %v3394_v18 = vpop.f32.mrf.mxu0 }
 0x1ef   : > { %v1269_v19 = vpop.f32.mrf.mxu0 }
 0x1f7   : > { %v3397_v20 = vpop.f32.mrf.mxu0 }
 0x1f9   : > { %v1279_v21 = vpop.f32.mrf.mxu0 }
 0x200   : > { %v3400_v22 = vpop.f32.mrf.mxu0 }
 0x202   : > { %v1289_v23 = vpop.f32.mrf.mxu0 }
 0x209   : > { %v3403_v24 = vpop.f32.mrf.mxu0 }
 0x20b   : > { %v1299_v25 = vpop.f32.mrf.mxu0 }
 0x211   : > { %v3406_v26 = vpop.f32.mrf.mxu0 }
 0x213   : > { %v1309_v27 = vpop.f32.mrf.mxu0 }
 0x215   : > { %v4261_v28 = vpop.f32.mrf.mxu0 }
 0x217   : > { %v4263_v29 = vpop.f32.mrf.mxu0 }
 0x21a   : > { %v4265_v30 = vpop.f32.mrf.mxu0 }
 0x21c   : > { %v4267_v31 = vpop.f32.mrf.mxu0 }
 0x21e   : > { %v4269_v32 = vpop.f32.mrf.mxu0 }
 0x220   : > { %v4271_v33 = vpop.f32.mrf.mxu0 }
 0x222   : > { %v3478_v35 = vpop.f32.mrf.mxu0 }
 0x223   : > { %v2179_v36 = vadd.f32 %v3478_v35, %v4273_v34 }
 0x224   : > { %v1598_v37 = vpop.f32.mrf.mxu0 }
 0x225   : > { %v2178_v38 = vadd.f32 %v4273_v34, %v1598_v37  ;;  %v2195_v40 = vadd.f32 %v3394_v18, %v2179_v36 }
 0x226   : > { %v3485_v39 = vpop.f32.mrf.mxu0 }
 0x227   : > { %v2194_v41 = vadd.f32 %v2178_v38, %v1269_v19  ;;  %v2181_v42 = vadd.f32 %v3485_v39, %v4273_v34 }
 0x228   : > { %v1679_v43 = vpop.f32.mrf.mxu0 }
 0x229   : > { %v2210_v44 = vadd.f32 %v2195_v40, %v2194_v41  ;;  %v2180_v45 = vadd.f32 %v4273_v34, %v1679_v43  ;;  %v2197_v48 = vadd.f32 %v3397_v20, %v2181_v42 }
 0x22a   : > { %v3492_v46 = vpop.f32.mrf.mxu0 }
 0x22b   : > { %v2211_v47 = vrot.slane %v2210_v44, 4  ;;  %v2196_v49 = vadd.f32 %v2180_v45, %v1279_v21  ;;  %v2183_v50 = vadd.f32 %v3492_v46, %v4273_v34 }
 0x22c   : > { %v1760_v51 = vpop.f32.mrf.mxu0 }
 0x22d   : > { %v2212_v52 = vadd.f32 %v2211_v47, %v2210_v44  ;;  %v2217_v53 = vadd.f32 %v2197_v48, %v2196_v49  ;;  %v2182_v54 = vadd.f32 %v4273_v34, %v1760_v51  ;;  %v4281_v58 = vadd.f32 %v3400_v22, %v2183_v50 }
 0x22e   : > { %v3499_v55 = vpop.f32.mrf.mxu0 }
 0x22f   : > { %v2213_v56 = vrot.slane %v2212_v52, 2  ;;  %v2218_v57 = vrot.slane %v2217_v53, 4  ;;  %v4283_v59 = vadd.f32 %v2182_v54, %v1289_v23  ;;  %v2185_v60 = vadd.f32 %v3499_v55, %v4273_v34 }
 0x230   : > { %v1841_v61 = vpop.f32.mrf.mxu0 }
 0x231   : > { %v2214_v62 = vadd.f32 %v2213_v56, %v2212_v52  ;;  %v2219_v63 = vadd.f32 %v2218_v57, %v2217_v53  ;;  %v2224_v0 = vadd.f32 %v4281_v58, %v4283_v59  ;;  %v2184_v1 = vadd.f32 %v4273_v34, %v1841_v61 }
 0x232   : > { %v3506_v2 = vpop.f32.mrf.mxu0  ;;  %v4289_v6 = vadd.f32 %v3403_v24, %v2185_v60 }
 0x233   : > { %v2215_v3 = vrot.slane %v2214_v62, 1  ;;  %v2220_v4 = vrot.slane %v2219_v63, 2  ;;  %v2225_v5 = vrot.slane %v2224_v0, 4  ;;  %v4291_v7 = vadd.f32 %v2184_v1, %v1299_v25 }
 0x234   : > { %v2187_v8 = vadd.f32 %v3506_v2, %v4273_v34  ;;  %v1922_v9 = vpop.f32.mrf.mxu0 }
 0x235   : > { %v2216_v10 = vadd.f32 %v2215_v3, %v2214_v62  ;;  %v2221_v11 = vadd.f32 %v2220_v4, %v2219_v63  ;;  %v2226_v12 = vadd.f32 %v2225_v5, %v2224_v0  ;;  %v2231_v13 = vadd.f32 %v4289_v6, %v4291_v7 }
 0x236   : > { %v2186_v14 = vadd.f32 %v4273_v34, %v1922_v9  ;;  %v3513_v15 = vpop.f32.mrf.mxu0  ;;  %v4298_v21 = vadd.f32 %v3406_v26, %v2187_v8 }
 0x237   : > { %v2267_v16 = vmul.f32 0.0625, %v2216_v10  ;;  %v2222_v17 = vrot.slane %v2221_v11, 1  ;;  %v2227_v18 = vrot.slane %v2226_v12, 2  ;;  %v2189_v19 = vadd.f32 %v3513_v15, %v4273_v34 }
 0x238   : > { %v2232_v20 = vrot.slane %v2231_v13, 4  ;;  %v4300_v22 = vadd.f32 %v2186_v14, %v1309_v27  ;;  %v2003_v23 = vpop.f32.mrf.mxu0 }
 0x239   : > { %v4302_v24 = vsub.f32 %v2194_v41, %v2267_v16  ;;  %v4304_v25 = vsub.f32 %v2195_v40, %v2267_v16  ;;  %v2223_v35 = vadd.f32 %v2222_v17, %v2221_v11  ;;  %v2228_v36 = vadd.f32 %v2227_v18, %v2226_v12 }
 0x23a   : > { %v2233_v37 = vadd.f32 %v2232_v20, %v2231_v13  ;;  %v2238_v38 = vadd.f32 %v4298_v21, %v4300_v22  ;;  %v4309_v39 = vadd.f32 %v4261_v28, %v2189_v19  ;;  %v2188_v42 = vadd.f32 %v4273_v34, %v2003_v23  ;;  %v3520_v26 = vpop.f32.mrf.mxu0 }
 0x23b   : > { %v2291_v27 = vmul.f32 %v4302_v24, %v4302_v24  ;;  %v2292_v41 = vmul.f32 %v4304_v25, %v4304_v25  ;;  %v2268_v40 = vmul.f32 0.0625, %v2223_v35  ;;  %v2229_v43 = vrot.slane %v2228_v36, 1 }
 0x23c   : > { %v2234_v44 = vrot.slane %v2233_v37, 2  ;;  %v2239_v45 = vrot.slane %v2238_v38, 4  ;;  %v4317_v46 = vadd.f32 %v2188_v42, %v4263_v29  ;;  %v2191_v47 = vadd.f32 %v3520_v26, %v4273_v34  ;;  %v2084_v53 = vpop.f32.mrf.mxu0 }
 0x23d   : > { %v2307_v28 = vadd.f32 %v2292_v41, %v2291_v27  ;;  %v4320_v50 = vsub.f32 %v2196_v49, %v2268_v40  ;;  %v4322_v51 = vsub.f32 %v2197_v48, %v2268_v40  ;;  %v2230_v52 = vadd.f32 %v2229_v43, %v2228_v36 }
 0x23e   : > { %v2235_v54 = vadd.f32 %v2234_v44, %v2233_v37  ;;  %v2240_v55 = vadd.f32 %v2239_v45, %v2238_v38  ;;  %v2245_v56 = vadd.f32 %v4309_v39, %v4317_v46  ;;  %v4327_v57 = vadd.f32 %v4265_v30, %v2191_v47  ;;  %v3527_v10 = vpop.f32.mrf.mxu0 }
 0x23f   : > { %v2308_v60 = vrot.slane %v2307_v28, 4  ;;  %v2293_v29 = vmul.f32 %v4320_v50, %v4320_v50  ;;  %v2294_v49 = vmul.f32 %v4322_v51, %v4322_v51  ;;  %v2269_v61 = vmul.f32 0.0625, %v2230_v52 }
 0x240   : > { %v2236_v48 = vrot.slane %v2235_v54, 1  ;;  %v2241_v62 = vrot.slane %v2240_v55, 2  ;;  %v2246_v63 = vrot.slane %v2245_v56, 4  ;;  %v2190_v0 = vadd.f32 %v4273_v34, %v2084_v53 }
 0x241   : > { %v2309_v1 = vadd.f32 %v2308_v60, %v2307_v28  ;;  %v2314_v2 = vadd.f32 %v2294_v49, %v2293_v29  ;;  %v4335_v3 = vsub.f32 %v4283_v59, %v2269_v61  ;;  %v4338_v30 = vsub.f32 %v4281_v58, %v2269_v61 }
 0x242   : > { %v2237_v4 = vadd.f32 %v2236_v48, %v2235_v54  ;;  %v2242_v5 = vadd.f32 %v2241_v62, %v2240_v55  ;;  %v2247_v8 = vadd.f32 %v2246_v63, %v2245_v56  ;;  %v4341_v9 = vadd.f32 %v2190_v0, %v4267_v31 }
 0x243   : > { %v2310_v11 = vrot.slane %v2309_v1, 2  ;;  %v2315_v12 = vrot.slane %v2314_v2, 4  ;;  %v2295_v13 = vmul.f32 %v4335_v3, %v4335_v3  ;;  %v2296_v14 = vmul.f32 %v4338_v30, %v4338_v30 }
 0x244   : > { %v2270_v59 = vmul.f32 0.0625, %v2237_v4  ;;  %v2243_v15 = vrot.slane %v2242_v5, 1  ;;  %v2248_v16 = vrot.slane %v2247_v8, 2  ;;  %v2252_v58 = vadd.f32 %v4327_v57, %v4341_v9 }
 0x245   : > { %v2311_v17 = vadd.f32 %v2310_v11, %v2309_v1  ;;  %v2316_v18 = vadd.f32 %v2315_v12, %v2314_v2  ;;  %v2321_v19 = vadd.f32 %v2296_v14, %v2295_v13  ;;  %v2193_v31 = vadd.f32 %v3527_v10, %v4273_v34  ;;  %v2165_v11 = vpop.f32.mrf.mxu0 }
 0x246   : > { %v4351_v20 = vsub.f32 %v4291_v7, %v2270_v59  ;;  %v4354_v23 = vsub.f32 %v4289_v6, %v2270_v59  ;;  %v2244_v35 = vadd.f32 %v2243_v15, %v2242_v5  ;;  %v2249_v36 = vadd.f32 %v2248_v16, %v2247_v8 }
 0x247   : > { %v2312_v37 = vrot.slane %v2311_v17, 1  ;;  %v2317_v38 = vrot.slane %v2316_v18, 2  ;;  %v2322_v42 = vrot.slane %v2321_v19, 4  ;;  %v2253_v26 = vrot.slane %v2252_v58, 4 }
 0x248   : > { %v2297_v27 = vmul.f32 %v4351_v20, %v4351_v20  ;;  %v2298_v41 = vmul.f32 %v4354_v23, %v4354_v23  ;;  %v2271_v40 = vmul.f32 0.0625, %v2244_v35  ;;  %v2250_v43 = vrot.slane %v2249_v36, 1 }
 0x249   : > { %v2313_v44 = vadd.f32 %v2312_v37, %v2311_v17  ;;  %v2318_v7 = vadd.f32 %v2317_v38, %v2316_v18  ;;  %v2323_v45 = vadd.f32 %v2322_v42, %v2321_v19  ;;  %v2254_v47 = vadd.f32 %v2253_v26, %v2252_v58 }
 0x24a   : > { %v2328_v6 = vadd.f32 %v2298_v41, %v2297_v27  ;;  %v4361_v28 = vsub.f32 %v4300_v22, %v2271_v40  ;;  %v4364_v52 = vsub.f32 %v4298_v21, %v2271_v40  ;;  %v2251_v53 = vadd.f32 %v2250_v43, %v2249_v36 }
 0x24b   : > { %v2363_v54 = vmul.f32 0.0625, %v2313_v44  ;;  %v2319_v55 = vrot.slane %v2318_v7, 1  ;;  %v2324_v56 = vrot.slane %v2323_v45, 2  ;;  %v2255_v60 = vrot.slane %v2254_v47, 2 }
 0x24c   : > { %v2329_v29 = vrot.slane %v2328_v6, 4  ;;  %v2299_v49 = vmul.f32 %v4361_v28, %v4361_v28  ;;  %v2300_v61 = vmul.f32 %v4364_v52, %v4364_v52  ;;  %v2272_v48 = vmul.f32 0.0625, %v2251_v53 }
 0x24d   : > { %v2371_v62 = vadd.f32 1e-05, %v2363_v54  ;;  %v2320_v63 = vadd.f32 %v2319_v55, %v2318_v7  ;;  %v2325_v22 = vadd.f32 %v2324_v56, %v2323_v45  ;;  %v2256_v0 = vadd.f32 %v2255_v60, %v2254_v47 }
 0x24e   : > { %v2330_v1 = vadd.f32 %v2329_v29, %v2328_v6  ;;  %v2335_v21 = vadd.f32 %v2300_v61, %v2299_v49  ;;  %v4371_v2 = vsub.f32 %v4317_v46, %v2272_v48  ;;  %v4374_v4 = vsub.f32 %v4309_v39, %v2272_v48  ;;  %v4396_v29 = vld [vmem:[#allocation7 + $0x2] ss:$0 sm:$0xff] }
 0x24f   : > { %3655 = vrsqrt.f32 %v2371_v62  ;;  %v2364_v5 = vmul.f32 0.0625, %v2320_v63  ;;  %v2326_v8 = vrot.slane %v2325_v22, 1  ;;  %v2257_v10 = vrot.slane %v2256_v0, 1 }
 0x250   : > { %v2331_v12 = vrot.slane %v2330_v1, 2  ;;  %v2336_v13 = vrot.slane %v2335_v21, 4  ;;  %v2301_v14 = vmul.f32 %v4371_v2, %v4371_v2  ;;  %v2302_v59 = vmul.f32 %v4374_v4, %v4374_v4 }
 0x251   : > { %v2372_v15 = vadd.f32 1e-05, %v2364_v5  ;;  %v2327_v16 = vadd.f32 %v2326_v8, %v2325_v22  ;;  %v2258_v46 = vadd.f32 %v2257_v10, %v2256_v0  ;;  %v2192_v18 = vadd.f32 %v4273_v34, %v2165_v11  ;;  %v4400_v5 = vld [vmem:[#allocation7 + $0x3] ss:$0 sm:$0xff] }
 0x252   : > { %v2332_v58 = vadd.f32 %v2331_v12, %v2330_v1  ;;  %v2337_v17 = vadd.f32 %v2336_v13, %v2335_v21  ;;  %v2342_v39 = vadd.f32 %v2302_v59, %v2301_v14  ;;  %v4382_v36 = vadd.f32 %v4269_v32, %v2193_v31 }
 0x253   : > { %3657 = vrsqrt.f32 %v2372_v15  ;;  %v2365_v19 = vmul.f32 0.0625, %v2327_v16  ;;  %v2273_v35 = vmul.f32 0.0625, %v2258_v46  ;;  %v2208_v26 = vadd.f32 %v2192_v18, %v4271_v33 }
 0x254   : > { %v2333_v37 = vrot.slane %v2332_v58, 1  ;;  %v2338_v38 = vrot.slane %v2337_v17, 2  ;;  %v2343_v42 = vrot.slane %v2342_v39, 4 }
 0x255   : > { %v2373_v27 = vadd.f32 1e-05, %v2365_v19  ;;  %v4386_v41 = vsub.f32 %v4341_v9, %v2273_v35  ;;  %v4389_v40 = vsub.f32 %v4327_v57, %v2273_v35  ;;  %v2259_v7 = vadd.f32 %v4382_v36, %v2208_v26 }
 0x256   : > { %v2334_v43 = vadd.f32 %v2333_v37, %v2332_v58  ;;  %v2339_v34 = vadd.f32 %v2338_v38, %v2337_v17  ;;  %v2344_v44 = vadd.f32 %v2343_v42, %v2342_v39 }
 0x257   : > { %3659 = vrsqrt.f32 %v2373_v27  ;;  %v2303_v32 = vmul.f32 %v4386_v41, %v4386_v41  ;;  %v2304_v31 = vmul.f32 %v4389_v40, %v4389_v40  ;;  %v2260_v9 = vrot.slane %v2259_v7, 4 }
 0x258   : > { %v2366_v33 = vmul.f32 0.0625, %v2334_v43  ;;  %v2340_v45 = vrot.slane %v2339_v34, 1  ;;  %v2345_v47 = vrot.slane %v2344_v44, 2 }
 0x259   : > { %v2349_v6 = vadd.f32 %v2304_v31, %v2303_v32  ;;  %v2261_v55 = vadd.f32 %v2260_v9, %v2259_v7 }
 0x25a   : > { %v2374_v53 = vadd.f32 1e-05, %v2366_v33  ;;  %v2341_v57 = vadd.f32 %v2340_v45, %v2339_v34  ;;  %v2346_v54 = vadd.f32 %v2345_v47, %v2344_v44 }
 0x25b   : > { %v2350_v56 = vrot.slane %v2349_v6, 4  ;;  %v2262_v48 = vrot.slane %v2261_v55, 2 }
 0x25c   : > { %v3656_v60 = vpop.eup %3655  ;;  %3661 = vrsqrt.f32 %v2374_v53  ;;  %v2367_v49 = vmul.f32 0.0625, %v2341_v57  ;;  %v2347_v61 = vrot.slane %v2346_v54, 1 }
 0x25d   : > { %v2387_v62 = vmul.f32 %v3656_v60, %v4302_v24  ;;  %v2388_v63 = vmul.f32 %v3656_v60, %v4304_v25  ;;  %v2351_v22 = vadd.f32 %v2350_v56, %v2349_v6  ;;  %v2263_v21 = vadd.f32 %v2262_v48, %v2261_v55 }
 0x25e   : > { %v2375_v0 = vadd.f32 1e-05, %v2367_v49  ;;  %v2348_v1 = vadd.f32 %v2347_v61, %v2346_v54 }
 0x25f   : > { %v2408_v8 = vmul.f32 %v4396_v29, %v2388_v63  ;;  %v2352_v10 = vrot.slane %v2351_v22, 2  ;;  %v2407_v11 = vmul.f32 %v4396_v29, %v2387_v62  ;;  %v2264_v14 = vrot.slane %v2263_v21, 1 }
 0x260   : > { %v3658_v12 = vpop.eup %3657  ;;  %3663 = vrsqrt.f32 %v2375_v0  ;;  %v2368_v13 = vmul.f32 0.0625, %v2348_v1 }
 0x261   : > { %v2389_v59 = vmul.f32 %v3658_v12, %v4320_v50  ;;  %v2353_v24 = vadd.f32 %v2352_v10, %v2351_v22  ;;  %v2427_v25 = vadd.f32 %v4400_v5, %v2407_v11  ;;  %v2428_v15 = vadd.f32 %v4400_v5, %v2408_v8 }
 0x262   : > { %v2376_v16 = vadd.f32 1e-05, %v2368_v13  ;;  %v2265_v46 = vadd.f32 %v2264_v14, %v2263_v21  ;;  %v2390_v58 = vmul.f32 %v3658_v12, %v4322_v51 }
 0x263   : > { %v2354_v17 = vrot.slane %v2353_v24, 1  ;;  %v2443_v39 = vmax.f32 %v2427_v25, 0.0  ;;  %v2444_v18 = vmax.f32 %v2428_v15, 0.0  ;;  %v2409_v19 = vmul.f32 %v4396_v29, %v2389_v59 }
 0x264   : > { %v3660_v35 = vpop.eup %3659  ;;  %3665 = vrsqrt.f32 %v2376_v16  ;;  %v2274_v37 = vmul.f32 0.0625, %v2265_v46  ;;  %v2410_v38 = vmul.f32 %v4396_v29, %v2390_v58 }
 0x265   : > { %v2391_v50 = vmul.f32 %v3660_v35, %v4335_v3  ;;  %v2355_v42 = vadd.f32 %v2354_v17, %v2353_v24  ;;  %3560 = vmatprep.mubr.f32.mxu1 %v2443_v39  ;;  %v2429_v27 = vadd.f32 %v4400_v5, %v2409_v19  ;;  %v2392_v43 = vmul.f32 %v3660_v35, %v4338_v30 }
 0x266   : > { %v4413_v34 = vsub.f32 %v2208_v26, %v2274_v37  ;;  %v4416_v51 = vsub.f32 %v4382_v36, %v2274_v37  ;;  %3561 = vmatmul.mubr.f32.vlgmr.msra.gmra.mxu1 %v2444_v18  ;;  %v2430_v44 = vadd.f32 %v4400_v5, %v2410_v38 }
 0x267   : > { %v2369_v7 = vmul.f32 0.0625, %v2355_v42  ;;  %v2445_v32 = vmax.f32 %v2429_v27, 0.0  ;;  %v2411_v31 = vmul.f32 %v4396_v29, %v2391_v50  ;;  %v2412_v3 = vmul.f32 %v4396_v29, %v2392_v43 }
 0x268   : > { %v2305_v33 = vmul.f32 %v4413_v34, %v4413_v34  ;;  %v2306_v30 = vmul.f32 %v4416_v51, %v4416_v51  ;;  %v2446_v26 = vmax.f32 %v2430_v44, 0.0 }
 0x269   : > { %v3662_v45 = vpop.eup %3661  ;;  %v2377_v47 = vadd.f32 1e-05, %v2369_v7  ;;  %3563 = vmatprep.mubr.f32.mxu1 %v2445_v32  ;;  %v2431_v36 = vadd.f32 %v4400_v5, %v2411_v31  ;;  %v2432_v9 = vadd.f32 %v4400_v5, %v2412_v3 }
 0x26a   : > { %v2393_v6 = vmul.f32 %v3662_v45, %v4351_v20  ;;  %v2356_v53 = vadd.f32 %v2306_v30, %v2305_v33  ;;  %3564 = vmatmul.mubr.f32.gmra.mxu1 %v2446_v26  ;;  %v2394_v57 = vmul.f32 %v3662_v45, %v4354_v23  ;;  %v4457_v26 = vld [vmem:[#allocation7 + $0x1] ss:$0 sm:$0xff] }
 0x26b   : > { %3667 = vrsqrt.f32 %v2377_v47  ;;  %v2447_v54 = vmax.f32 %v2431_v36, 0.0  ;;  %v2448_v55 = vmax.f32 %v2432_v9, 0.0 }
 0x26c   : > { %v2357_v56 = vrot.slane %v2356_v53, 4  ;;  %v2413_v60 = vmul.f32 %v4396_v29, %v2393_v6  ;;  %v2414_v49 = vmul.f32 %v4396_v29, %v2394_v57  ;;  %v3688_v6 = vld [vmem:[%s4174_s18] sm:$0xff] }
 0x26d   : > { %v3664_v61 = vpop.eup %3663  ;;  %3566 = vmatprep.mubr.f32.mxu1 %v2447_v54 }
 0x26e   : > { %v2395_v48 = vmul.f32 %v3664_v61, %v4361_v28  ;;  %v2358_v62 = vadd.f32 %v2357_v56, %v2356_v53  ;;  %3567 = vmatmul.mubr.f32.gmra.mxu1 %v2448_v55  ;;  %v2433_v20 = vadd.f32 %v4400_v5, %v2413_v60  ;;  %v2434_v63 = vadd.f32 %v4400_v5, %v2414_v49  ;;  %v3689_v49 = vld [vmem:[%s4174_s18 + $0x18] sm:$0xff] }
 0x26f   : > { %v2396_v23 = vmul.f32 %v3664_v61, %v4364_v52 }
 0x270   : > { %v2359_v22 = vrot.slane %v2358_v62, 2  ;;  %v2449_v0 = vmax.f32 %v2433_v20, 0.0  ;;  %v2450_v1 = vmax.f32 %v2434_v63, 0.0  ;;  %v2415_v21 = vmul.f32 %v4396_v29, %v2395_v48  ;;  %v3690_v48 = vld [vmem:[%s4174_s18 + $0x10] sm:$0xff] }
 0x271   : > { %v3666_v8 = vpop.eup %3665  ;;  %v2416_v10 = vmul.f32 %v4396_v29, %v2396_v23 }
 0x272   : > { %v2397_v11 = vmul.f32 %v3666_v8, %v4371_v2  ;;  %v2360_v12 = vadd.f32 %v2359_v22, %v2358_v62  ;;  %3569 = vmatprep.mubr.f32.mxu1 %v2449_v0  ;;  %v2435_v28 = vadd.f32 %v4400_v5, %v2415_v21  ;;  %v2398_v13 = vmul.f32 %v3666_v8, %v4374_v4  ;;  %v3691_v8 = vld [vmem:[%s4174_s18 + $0x28] sm:$0xff] }
 0x273   : > { %3570 = vmatmul.mubr.f32.gmra.mxu1 %v2450_v1  ;;  %v2436_v14 = vadd.f32 %v4400_v5, %v2416_v10 }
 0x274   : > { %v2361_v52 = vrot.slane %v2360_v12, 1  ;;  %v2451_v59 = vmax.f32 %v2435_v28, 0.0  ;;  %v2417_v24 = vmul.f32 %v4396_v29, %v2397_v11  ;;  %v2418_v25 = vmul.f32 %v4396_v29, %v2398_v13  ;;  %v3692_v11 = vld [vmem:[%s4174_s18 + $0x20] sm:$0xff] }
 0x275   : > { %v2452_v15 = vmax.f32 %v2436_v14, 0.0 }
 0x276   : > { %v2362_v16 = vadd.f32 %v2361_v52, %v2360_v12  ;;  %3572 = vmatprep.mubr.f32.mxu1 %v2451_v59  ;;  %v2437_v2 = vadd.f32 %v4400_v5, %v2417_v24  ;;  %v2438_v46 = vadd.f32 %v4400_v5, %v2418_v25 }
 0x277   : > { %3573 = vmatmul.mubr.f32.gmra.mxu1 %v2452_v15 }
 0x278   : > { %v3668_v58 = vpop.eup %3667  ;;  %v2370_v17 = vmul.f32 0.0625, %v2362_v16  ;;  %v2453_v4 = vmax.f32 %v2437_v2, 0.0  ;;  %v2454_v39 = vmax.f32 %v2438_v46, 0.0 }
 0x279   : > { %v2399_v18 = vmul.f32 %v3668_v58, %v4386_v41  ;;  %v2400_v19 = vmul.f32 %v3668_v58, %v4389_v40  ;;  %v3693_v58 = vld [vmem:[%s4174_s18 + $0x38] sm:$0xff] }
 0x27a   : > { %v2378_v35 = vadd.f32 1e-05, %v2370_v17  ;;  %3575 = vmatprep.mubr.f32.mxu1 %v2453_v4  ;;  %v3694_v4 = vld [vmem:[%s4174_s18 + $0x30] sm:$0xff] }
 0x27b   : > { %3576 = vmatmul.mubr.f32.gmra.mxu1 %v2454_v39  ;;  %v2419_v37 = vmul.f32 %v4396_v29, %v2399_v18  ;;  %v2420_v38 = vmul.f32 %v4396_v29, %v2400_v19 }
 0x27c   : > { %3669 = vrsqrt.f32 %v2378_v35 }
 0x27d   : > { %v2439_v50 = vadd.f32 %v4400_v5, %v2419_v37  ;;  %v2440_v42 = vadd.f32 %v4400_v5, %v2420_v38 }
 0x27f   : > { %v2455_v27 = vmax.f32 %v2439_v50, 0.0  ;;  %v2456_v43 = vmax.f32 %v2440_v42, 0.0 }
 0x281   : > { %3578 = vmatprep.mubr.f32.mxu1 %v2455_v27 }
 0x282   : > { %3579 = vmatmul.mubr.f32.gmra.mxu1 %v2456_v43 }
 0x289   : > { %v3670_v44 = vpop.eup %3669 }
 0x28a   : > { %v2401_v41 = vmul.f32 %v3670_v44, %v4413_v34  ;;  %v2402_v40 = vmul.f32 %v3670_v44, %v4416_v51 }
 0x28c   : > { %v2421_v7 = vmul.f32 %v4396_v29, %v2401_v41  ;;  %v2422_v32 = vmul.f32 %v4396_v29, %v2402_v40  ;;  %v3687_v29 = vld [vmem:[%s4174_s18 + $0x8] sm:$0xff] }
 0x28e   : > { %v2441_v31 = vadd.f32 %v4400_v5, %v2421_v7  ;;  %v2442_v3 = vadd.f32 %v4400_v5, %v2422_v32  ;;  %v3695_v7 = vld [vmem:[%s4174_s18 + $0x48] sm:$0xff] }
 0x290   : > { %v2457_v33 = vmax.f32 %v2441_v31, 0.0  ;;  %v2458_v30 = vmax.f32 %v2442_v3, 0.0  ;;  %v3696_v31 = vld [vmem:[%s4174_s18 + $0x40] sm:$0xff] }
 0x292   : > { %3581 = vmatprep.mubr.f32.mxu1 %v2457_v33 }
 0x293   : > { %3582 = vmatmul.mubr.f32.gmra.mxu1 %v2458_v30 }
 0x326   : > { %v3562_v34 = vpop.f32.mrf.mxu1 }
 0x327   : > { %v2551_v45 = vadd.f32 %v3562_v34, %v4457_v26 }
 0x328   : > { %v2545_v51 = vpop.f32.mrf.mxu1 }
 0x329   : > { %v2546_v47 = vadd.f32 %v4457_v26, %v2545_v51  ;;  %v2625_v9 = vadd.f32 %v3687_v29, %v2551_v45 }
 0x32a   : > { %v3565_v36 = vpop.f32.mrf.mxu1 }
 0x32b   : > { %v2624_v53 = vadd.f32 %v3688_v6, %v2546_v47  ;;  %v2561_v5 = vadd.f32 %v3565_v36, %v4457_v26 }
 0x32c   : > { %v2555_v57 = vpop.f32.mrf.mxu1 }
 0x32d   : > { %v2640_v54 = vadd.f32 %v2625_v9, %v2624_v53  ;;  %v2556_v55 = vadd.f32 %v4457_v26, %v2555_v57  ;;  %v4466_v61 = vadd.f32 %v3689_v49, %v2561_v5  ;;  %v3698_v49 = vld [vmem:[%s4174_s18 + $0x50] sm:$0xff] }
 0x32e   : > { %v3568_v56 = vpop.f32.mrf.mxu1 }
 0x32f   : > { %v2641_v60 = vrot.slane %v2640_v54, 4  ;;  %v4469_v62 = vadd.f32 %v3690_v48, %v2556_v55  ;;  %v2571_v20 = vadd.f32 %v3568_v56, %v4457_v26  ;;  %v3697_v56 = vld [vmem:[%s4174_s18 + $0x58] sm:$0xff] }
 0x330   : > { %v2565_v63 = vpop.f32.mrf.mxu1 }
 0x331   : > { %v2642_v23 = vadd.f32 %v2641_v60, %v2640_v54  ;;  %v2647_v22 = vadd.f32 %v4466_v61, %v4469_v62  ;;  %v2566_v0 = vadd.f32 %v4457_v26, %v2565_v63  ;;  %v4476_v10 = vadd.f32 %v3691_v8, %v2571_v20 }
 0x333   : > { %v2643_v1 = vrot.slane %v2642_v23, 2  ;;  %v2648_v21 = vrot.slane %v2647_v22, 4  ;;  %v4479_v12 = vadd.f32 %v3692_v11, %v2566_v0  ;;  %v3571_v28 = vpop.f32.mrf.mxu1 }
 0x334   : > { %v2581_v13 = vadd.f32 %v3571_v28, %v4457_v26 }
 0x335   : > { %v2644_v14 = vadd.f32 %v2643_v1, %v2642_v23  ;;  %v2649_v52 = vadd.f32 %v2648_v21, %v2647_v22  ;;  %v2654_v59 = vadd.f32 %v4476_v10, %v4479_v12  ;;  %v2575_v24 = vpop.f32.mrf.mxu1 }
 0x336   : > { %v2576_v25 = vadd.f32 %v4457_v26, %v2575_v24  ;;  %v4486_v17 = vadd.f32 %v3693_v58, %v2581_v13 }
 0x337   : > { %v2645_v15 = vrot.slane %v2644_v14, 1  ;;  %v2650_v16 = vrot.slane %v2649_v52, 2  ;;  %v2655_v2 = vrot.slane %v2654_v59, 4  ;;  %v3574_v46 = vpop.f32.mrf.mxu1 }
 0x338   : > { %v4489_v39 = vadd.f32 %v3694_v4, %v2576_v25  ;;  %v2591_v18 = vadd.f32 %v3574_v46, %v4457_v26 }
 0x339   : > { %v2646_v19 = vadd.f32 %v2645_v15, %v2644_v14  ;;  %v2651_v35 = vadd.f32 %v2650_v16, %v2649_v52  ;;  %v2656_v37 = vadd.f32 %v2655_v2, %v2654_v59  ;;  %v2585_v38 = vpop.f32.mrf.mxu1 }
 0x33a   : > { %v2661_v50 = vadd.f32 %v4486_v17, %v4489_v39  ;;  %v2586_v42 = vadd.f32 %v4457_v26, %v2585_v38  ;;  %v4496_v32 = vadd.f32 %v3695_v7, %v2591_v18 }
 0x33b   : > { %v2696_v27 = vmul.f32 0.0625, %v2646_v19  ;;  %v2652_v43 = vrot.slane %v2651_v35, 1  ;;  %v2657_v44 = vrot.slane %v2656_v37, 2  ;;  %v3577_v41 = vpop.f32.mrf.mxu1 }
 0x33c   : > { %v2662_v40 = vrot.slane %v2661_v50, 4  ;;  %v4499_v3 = vadd.f32 %v3696_v31, %v2586_v42  ;;  %v2601_v33 = vadd.f32 %v3577_v41, %v4457_v26 }
 0x33d   : > { %v4502_v30 = vsub.f32 %v2624_v53, %v2696_v27  ;;  %v4504_v34 = vsub.f32 %v2625_v9, %v2696_v27  ;;  %v2653_v45 = vadd.f32 %v2652_v43, %v2651_v35  ;;  %v2658_v51 = vadd.f32 %v2657_v44, %v2656_v37  ;;  %v2595_v47 = vpop.f32.mrf.mxu1  ;;  %v3699_v44 = vld [vmem:[%s4174_s18 + $0x68] sm:$0xff] }
 0x33e   : > { %v2663_v36 = vadd.f32 %v2662_v40, %v2661_v50  ;;  %v2668_v29 = vadd.f32 %v4496_v32, %v4499_v3  ;;  %v2596_v6 = vadd.f32 %v4457_v26, %v2595_v47  ;;  %v4514_v60 = vadd.f32 %v3697_v56, %v2601_v33 }
 0x33f   : > { %v2720_v5 = vmul.f32 %v4502_v30, %v4502_v30  ;;  %v2721_v57 = vmul.f32 %v4504_v34, %v4504_v34  ;;  %v2697_v53 = vmul.f32 0.0625, %v2653_v45  ;;  %v2659_v54 = vrot.slane %v2658_v51, 1 }
 0x340   : > { %v2664_v55 = vrot.slane %v2663_v36, 2  ;;  %v2669_v9 = vrot.slane %v2668_v29, 4  ;;  %v4517_v48 = vadd.f32 %v3698_v49, %v2596_v6 }
 0x341   : > { %v2736_v20 = vadd.f32 %v2721_v57, %v2720_v5  ;;  %v4520_v63 = vsub.f32 %v4469_v62, %v2697_v53  ;;  %v4523_v23 = vsub.f32 %v4466_v61, %v2697_v53  ;;  %v2660_v22 = vadd.f32 %v2659_v54, %v2658_v51 }
 0x342   : > { %v2665_v0 = vadd.f32 %v2664_v55, %v2663_v36  ;;  %v2670_v1 = vadd.f32 %v2669_v9, %v2668_v29  ;;  %v2675_v21 = vadd.f32 %v4514_v60, %v4517_v48  ;;  %v3580_v8 = vpop.f32.mrf.mxu1  ;;  %v3700_v36 = vld [vmem:[%s4174_s18 + $0x60] sm:$0xff] }
 0x343   : > { %v2737_v11 = vrot.slane %v2736_v20, 4  ;;  %v2722_v28 = vmul.f32 %v4520_v63, %v4520_v63  ;;  %v2723_v13 = vmul.f32 %v4523_v23, %v4523_v23  ;;  %v2698_v14 = vmul.f32 0.0625, %v2660_v22 }
 0x344   : > { %v2666_v62 = vrot.slane %v2665_v0, 1  ;;  %v2671_v52 = vrot.slane %v2670_v1, 2  ;;  %v2676_v59 = vrot.slane %v2675_v21, 4  ;;  %v2611_v61 = vadd.f32 %v3580_v8, %v4457_v26  ;;  %v2605_v2 = vpop.f32.mrf.mxu1 }
 0x345   : > { %v2738_v24 = vadd.f32 %v2737_v11, %v2736_v20  ;;  %v2743_v25 = vadd.f32 %v2723_v13, %v2722_v28  ;;  %v4533_v15 = vsub.f32 %v4479_v12, %v2698_v14  ;;  %v4536_v16 = vsub.f32 %v4476_v10, %v2698_v14 }
 0x346   : > { %v2667_v46 = vadd.f32 %v2666_v62, %v2665_v0  ;;  %v2672_v58 = vadd.f32 %v2671_v52, %v2670_v1  ;;  %v2677_v4 = vadd.f32 %v2676_v59, %v2675_v21  ;;  %v2606_v10 = vadd.f32 %v4457_v26, %v2605_v2 }
 0x347   : > { %v2739_v18 = vrot.slane %v2738_v24, 2  ;;  %v2744_v19 = vrot.slane %v2743_v25, 4  ;;  %v2724_v35 = vmul.f32 %v4533_v15, %v4533_v15  ;;  %v2725_v37 = vmul.f32 %v4536_v16, %v4536_v16 }
 0x348   : > { %v2699_v38 = vmul.f32 0.0625, %v2667_v46  ;;  %v2673_v12 = vrot.slane %v2672_v58, 1  ;;  %v2678_v50 = vrot.slane %v2677_v4, 2  ;;  %v4544_v41 = vadd.f32 %v3699_v44, %v2611_v61 }
 0x349   : > { %v2740_v42 = vadd.f32 %v2739_v18, %v2738_v24  ;;  %v2745_v27 = vadd.f32 %v2744_v19, %v2743_v25  ;;  %v2750_v43 = vadd.f32 %v2725_v37, %v2724_v35  ;;  %v4553_v29 = vadd.f32 %v3700_v36, %v2606_v10  ;;  %v3702_v36 = vld [vmem:[%s4174_s18 + $0x70] sm:$0xff] }
 0x34a   : > { %v4547_v40 = vsub.f32 %v4489_v39, %v2699_v38  ;;  %v4550_v7 = vsub.f32 %v4486_v17, %v2699_v38  ;;  %v2674_v31 = vadd.f32 %v2673_v12, %v2672_v58  ;;  %v2679_v33 = vadd.f32 %v2678_v50, %v2677_v4 }
 0x34b   : > { %v2741_v45 = vrot.slane %v2740_v42, 1  ;;  %v2746_v51 = vrot.slane %v2745_v27, 2  ;;  %v2751_v47 = vrot.slane %v2750_v43, 4  ;;  %v2682_v55 = vadd.f32 %v4544_v41, %v4553_v29 }
 0x34c   : > { %v2726_v6 = vmul.f32 %v4547_v40, %v4547_v40  ;;  %v2727_v5 = vmul.f32 %v4550_v7, %v4550_v7  ;;  %v2700_v57 = vmul.f32 0.0625, %v2674_v31  ;;  %v2680_v39 = vrot.slane %v2679_v33, 1  ;;  %v3701_v31 = vld [vmem:[%s4174_s18 + $0x78] sm:$0xff] }
 0x34d   : > { %v2742_v53 = vadd.f32 %v2741_v45, %v2740_v42  ;;  %v2747_v54 = vadd.f32 %v2746_v51, %v2745_v27  ;;  %v2752_v17 = vadd.f32 %v2751_v47, %v2750_v43  ;;  %v2683_v21 = vrot.slane %v2682_v55, 4 }
 0x34e   : > { %v2757_v9 = vadd.f32 %v2727_v5, %v2726_v6  ;;  %v4562_v56 = vsub.f32 %v4499_v3, %v2700_v57  ;;  %v4565_v49 = vsub.f32 %v4496_v32, %v2700_v57  ;;  %v2681_v20 = vadd.f32 %v2680_v39, %v2679_v33 }
 0x34f   : > { %v2792_v22 = vmul.f32 0.0625, %v2742_v53  ;;  %v2748_v0 = vrot.slane %v2747_v54, 1  ;;  %v2753_v1 = vrot.slane %v2752_v17, 2  ;;  %v2684_v52 = vadd.f32 %v2683_v21, %v2682_v55 }
 0x350   : > { %v2758_v8 = vrot.slane %v2757_v9, 4  ;;  %v2728_v11 = vmul.f32 %v4562_v56, %v4562_v56  ;;  %v2729_v28 = vmul.f32 %v4565_v49, %v4565_v49  ;;  %v2701_v13 = vmul.f32 0.0625, %v2681_v20 }
 0x351   : > { %v2800_v14 = vadd.f32 1e-05, %v2792_v22  ;;  %v2749_v62 = vadd.f32 %v2748_v0, %v2747_v54  ;;  %v2754_v3 = vadd.f32 %v2753_v1, %v2752_v17  ;;  %v2685_v46 = vrot.slane %v2684_v52, 2 }
 0x352   : > { %v2759_v59 = vadd.f32 %v2758_v8, %v2757_v9  ;;  %v2764_v32 = vadd.f32 %v2729_v28, %v2728_v11  ;;  %v4572_v61 = vsub.f32 %v4517_v48, %v2701_v13  ;;  %v4575_v24 = vsub.f32 %v4514_v60, %v2701_v13 }
 0x353   : > { %3671 = vrsqrt.f32 %v2800_v14  ;;  %v2793_v25 = vmul.f32 0.0625, %v2749_v62  ;;  %v2755_v2 = vrot.slane %v2754_v3, 1  ;;  %v3583_v58 = vpop.f32.mrf.mxu1  ;;  %v2686_v38 = vadd.f32 %v2685_v46, %v2684_v52 }
 0x354   : > { %v2760_v4 = vrot.slane %v2759_v59, 2  ;;  %v2765_v18 = vrot.slane %v2764_v32, 4  ;;  %v2730_v19 = vmul.f32 %v4572_v61, %v4572_v61  ;;  %v2731_v35 = vmul.f32 %v4575_v24, %v4575_v24 }
 0x355   : > { %v2801_v37 = vadd.f32 1e-05, %v2793_v25  ;;  %v2756_v48 = vadd.f32 %v2755_v2, %v2754_v3  ;;  %v2621_v60 = vadd.f32 %v3583_v58, %v4457_v26  ;;  %v2615_v12 = vpop.f32.mrf.mxu1  ;;  %v2687_v44 = vrot.slane %v2686_v38, 1  ;;  %v4601_v3 = vld [vmem:[#allocation7 + $0x4] ss:$0 sm:$0xff] }
 0x356   : > { %v2761_v50 = vadd.f32 %v2760_v4, %v2759_v59  ;;  %v2766_v10 = vadd.f32 %v2765_v18, %v2764_v32  ;;  %v2771_v42 = vadd.f32 %v2731_v35, %v2730_v19  ;;  %v2616_v27 = vadd.f32 %v4457_v26, %v2615_v12  ;;  %v4605_v2 = vld [vmem:[#allocation7 + $0x5] ss:$0 sm:$0xff] }
 0x357   : > { %3673 = vrsqrt.f32 %v2801_v37  ;;  %v2794_v43 = vmul.f32 0.0625, %v2756_v48  ;;  %v4584_v33 = vadd.f32 %v3701_v31, %v2621_v60  ;;  %v2688_v57 = vadd.f32 %v2687_v44, %v2686_v38 }
 0x358   : > { %v2762_v45 = vrot.slane %v2761_v50, 1  ;;  %v2767_v51 = vrot.slane %v2766_v10, 2  ;;  %v2772_v47 = vrot.slane %v2771_v42, 4  ;;  %v4587_v6 = vadd.f32 %v3702_v36, %v2616_v27 }
 0x359   : > { %v2802_v5 = vadd.f32 1e-05, %v2794_v43  ;;  %v2702_v17 = vmul.f32 0.0625, %v2688_v57 }
 0x35a   : > { %v2763_v39 = vadd.f32 %v2762_v45, %v2761_v50  ;;  %v2768_v53 = vadd.f32 %v2767_v51, %v2766_v10  ;;  %v2773_v54 = vadd.f32 %v2772_v47, %v2771_v42  ;;  %v2689_v26 = vadd.f32 %v4584_v33, %v4587_v6 }
 0x35b   : > { %3675 = vrsqrt.f32 %v2802_v5  ;;  %v4592_v0 = vsub.f32 %v4553_v29, %v2702_v17  ;;  %v4595_v1 = vsub.f32 %v4544_v41, %v2702_v17 }
 0x35c   : > { %v2795_v55 = vmul.f32 0.0625, %v2763_v39  ;;  %v2769_v9 = vrot.slane %v2768_v53, 1  ;;  %v2774_v20 = vrot.slane %v2773_v54, 2  ;;  %v2690_v22 = vrot.slane %v2689_v26, 4 }
 0x35d   : > { %v2732_v13 = vmul.f32 %v4592_v0, %v4592_v0  ;;  %v2733_v14 = vmul.f32 %v4595_v1, %v4595_v1 }
 0x35e   : > { %v2803_v21 = vadd.f32 1e-05, %v2795_v55  ;;  %v2770_v8 = vadd.f32 %v2769_v9, %v2768_v53  ;;  %v2775_v11 = vadd.f32 %v2774_v20, %v2773_v54  ;;  %v2691_v28 = vadd.f32 %v2690_v22, %v2689_v26 }
 0x35f   : > { %v2778_v25 = vadd.f32 %v2733_v14, %v2732_v13 }
 0x360   : > { %v3672_v62 = vpop.eup %3671  ;;  %3677 = vrsqrt.f32 %v2803_v21  ;;  %v2796_v52 = vmul.f32 0.0625, %v2770_v8  ;;  %v2776_v29 = vrot.slane %v2775_v11, 1  ;;  %v2692_v59 = vrot.slane %v2691_v28, 2 }
 0x361   : > { %v2816_v41 = vmul.f32 %v3672_v62, %v4502_v30  ;;  %v2817_v32 = vmul.f32 %v3672_v62, %v4504_v34  ;;  %v2779_v35 = vrot.slane %v2778_v25, 4 }
 0x362   : > { %v2804_v46 = vadd.f32 1e-05, %v2796_v52  ;;  %v2777_v58 = vadd.f32 %v2776_v29, %v2775_v11  ;;  %v2693_v4 = vadd.f32 %v2692_v59, %v2691_v28 }
 0x363   : > { %v2836_v18 = vmul.f32 %v4601_v3, %v2816_v41  ;;  %v2837_v19 = vmul.f32 %v4601_v3, %v2817_v32  ;;  %v2780_v10 = vadd.f32 %v2779_v35, %v2778_v25 }
 0x364   : > { %v3674_v37 = vpop.eup %3673  ;;  %3679 = vrsqrt.f32 %v2804_v46  ;;  %v2797_v48 = vmul.f32 0.0625, %v2777_v58  ;;  %v2694_v38 = vrot.slane %v2693_v4, 1 }
 0x365   : > { %v2856_v30 = vadd.f32 %v4605_v2, %v2836_v18  ;;  %v2857_v34 = vadd.f32 %v4605_v2, %v2837_v19  ;;  %v2818_v60 = vmul.f32 %v3674_v37, %v4520_v63  ;;  %v2819_v12 = vmul.f32 %v3674_v37, %v4523_v23 }
 0x366   : > { %v2805_v50 = vadd.f32 1e-05, %v2797_v48  ;;  %v2695_v42 = vadd.f32 %v2694_v38, %v2693_v4  ;;  %v2781_v51 = vrot.slane %v2780_v10, 2 }
 0x367   : > { %v2872_v27 = vmax.f32 %v2856_v30, 0.0  ;;  %v2873_v43 = vmax.f32 %v2857_v34, 0.0  ;;  %v2838_v44 = vmul.f32 %v4601_v3, %v2818_v60  ;;  %v2839_v31 = vmul.f32 %v4601_v3, %v2819_v12 }
 0x368   : > { %v3676_v45 = vpop.eup %3675  ;;  %3681 = vrsqrt.f32 %v2805_v50  ;;  %v2703_v47 = vmul.f32 0.0625, %v2695_v42  ;;  %v2782_v57 = vadd.f32 %v2781_v51, %v2780_v10 }
 0x369   : > { %2888 = vst [vmem:[%s4617_s13] sm:$0xff] %v2872_v27  ;;  %2889 = vst [vmem:[%s4617_s13 + $0x8] sm:$0xff] %v2873_v43  ;;  %v2858_v63 = vadd.f32 %v4605_v2, %v2838_v44  ;;  %v2859_v23 = vadd.f32 %v4605_v2, %v2839_v31  ;;  %v2820_v36 = vmul.f32 %v3676_v45, %v4533_v15 }
 0x36a   : > { %v2821_v5 = vmul.f32 %v3676_v45, %v4536_v16  ;;  %v4626_v39 = vsub.f32 %v4587_v6, %v2703_v47  ;;  %v4629_v53 = vsub.f32 %v4584_v33, %v2703_v47  ;;  %v2783_v9 = vrot.slane %v2782_v57, 1 }
 0x36b   : > { %v2874_v54 = vmax.f32 %v2858_v63, 0.0  ;;  %v2875_v26 = vmax.f32 %v2859_v23, 0.0  ;;  %v2840_v17 = vmul.f32 %v4601_v3, %v2820_v36 }
 0x36c   : > { %v2841_v55 = vmul.f32 %v4601_v3, %v2821_v5  ;;  %v2734_v20 = vmul.f32 %v4626_v39, %v4626_v39  ;;  %v2735_v15 = vmul.f32 %v4629_v53, %v4629_v53  ;;  %v2784_v8 = vadd.f32 %v2783_v9, %v2782_v57 }
 0x36d   : > { %v3678_v16 = vpop.eup %3677  ;;  %2890 = vst [vmem:[%s4617_s13 + $0x10] sm:$0xff] %v2874_v54  ;;  %2891 = vst [vmem:[%s4617_s13 + $0x18] sm:$0xff] %v2875_v26  ;;  %v2860_v33 = vadd.f32 %v4605_v2, %v2840_v17 }
 0x36e   : > { %v2861_v6 = vadd.f32 %v4605_v2, %v2841_v55  ;;  %v2822_v22 = vmul.f32 %v3678_v16, %v4547_v40  ;;  %v2823_v21 = vmul.f32 %v3678_v16, %v4550_v7  ;;  %v2785_v11 = vadd.f32 %v2735_v15, %v2734_v20 }
 0x36f   : > { %v2876_v28 = vmax.f32 %v2860_v33, 0.0  ;;  %v2798_v52 = vmul.f32 0.0625, %v2784_v8 }
 0x370   : > { %v2877_v13 = vmax.f32 %v2861_v6, 0.0  ;;  %v2842_v14 = vmul.f32 %v4601_v3, %v2822_v22  ;;  %v2843_v62 = vmul.f32 %v4601_v3, %v2823_v21  ;;  %v2786_v29 = vrot.slane %v2785_v11, 4 }
 0x371   : > { %v3680_v59 = vpop.eup %3679  ;;  %2892 = vst [vmem:[%s4617_s13 + $0x20] sm:$0xff] %v2876_v28  ;;  %v2806_v25 = vadd.f32 1e-05, %v2798_v52 }
 0x372   : > { %2893 = vst [vmem:[%s4617_s13 + $0x28] sm:$0xff] %v2877_v13  ;;  %v2862_v41 = vadd.f32 %v4605_v2, %v2842_v14  ;;  %v2863_v40 = vadd.f32 %v4605_v2, %v2843_v62  ;;  %v2824_v7 = vmul.f32 %v3680_v59, %v4562_v56  ;;  %v2825_v32 = vmul.f32 %v3680_v59, %v4565_v49 }
 0x373   : > { %v2787_v46 = vadd.f32 %v2786_v29, %v2785_v11  ;;  %3683 = vrsqrt.f32 %v2806_v25 }
 0x374   : > { %v2878_v58 = vmax.f32 %v2862_v41, 0.0  ;;  %v2879_v4 = vmax.f32 %v2863_v40, 0.0  ;;  %v2844_v18 = vmul.f32 %v4601_v3, %v2824_v7  ;;  %v2845_v19 = vmul.f32 %v4601_v3, %v2825_v32 }
 0x375   : > { %v3682_v35 = vpop.eup %3681  ;;  %v2788_v37 = vrot.slane %v2787_v46, 2 }
 0x376   : > { %2894 = vst [vmem:[%s4617_s13 + $0x30] sm:$0xff] %v2878_v58  ;;  %2895 = vst [vmem:[%s4617_s13 + $0x38] sm:$0xff] %v2879_v4  ;;  %v2864_v48 = vadd.f32 %v4605_v2, %v2844_v18  ;;  %v2865_v56 = vadd.f32 %v4605_v2, %v2845_v19  ;;  %v2826_v49 = vmul.f32 %v3682_v35, %v4572_v61 }
 0x377   : > { %v2827_v38 = vmul.f32 %v3682_v35, %v4575_v24  ;;  %v2789_v30 = vadd.f32 %v2788_v37, %v2787_v46 }
 0x378   : > { %v2880_v34 = vmax.f32 %v2864_v48, 0.0  ;;  %v2881_v60 = vmax.f32 %v2865_v56, 0.0  ;;  %v2846_v12 = vmul.f32 %v4601_v3, %v2826_v49 }
 0x379   : > { %v2847_v50 = vmul.f32 %v4601_v3, %v2827_v38  ;;  %v2790_v10 = vrot.slane %v2789_v30, 1 }
 0x37a   : > { %2896 = vst [vmem:[%s4617_s13 + $0x40] sm:$0xff] %v2880_v34  ;;  %2897 = vst [vmem:[%s4617_s13 + $0x48] sm:$0xff] %v2881_v60  ;;  %v2866_v42 = vadd.f32 %v4605_v2, %v2846_v12 }
 0x37b   : > { %v2867_v27 = vadd.f32 %v4605_v2, %v2847_v50  ;;  %v2791_v43 = vadd.f32 %v2790_v10, %v2789_v30 }
 0x37c   : > { %v2882_v61 = vmax.f32 %v2866_v42, 0.0 }
 0x37d   : > { %v2883_v44 = vmax.f32 %v2867_v27, 0.0  ;;  %v2799_v24 = vmul.f32 0.0625, %v2791_v43 }
 0x37e   : > { %2898 = vst [vmem:[%s4617_s13 + $0x50] sm:$0xff] %v2882_v61 }
 0x37f   : > { %2899 = vst [vmem:[%s4617_s13 + $0x58] sm:$0xff] %v2883_v44  ;;  %v2807_v31 = vadd.f32 1e-05, %v2799_v24 }
 0x380   : > { %v3684_v45 = vpop.eup %3683 }
 0x381   : > { %3685 = vrsqrt.f32 %v2807_v31  ;;  %v2828_v51 = vmul.f32 %v3684_v45, %v4592_v0  ;;  %v2829_v47 = vmul.f32 %v3684_v45, %v4595_v1 }
 0x383   : > { %v2848_v63 = vmul.f32 %v4601_v3, %v2828_v51  ;;  %v2849_v23 = vmul.f32 %v4601_v3, %v2829_v47 }
 0x385   : > { %v2868_v36 = vadd.f32 %v4605_v2, %v2848_v63  ;;  %v2869_v5 = vadd.f32 %v4605_v2, %v2849_v23 }
 0x387   : > { %v2884_v57 = vmax.f32 %v2868_v36, 0.0  ;;  %v2885_v54 = vmax.f32 %v2869_v5, 0.0 }
 0x389   : > { %2900 = vst [vmem:[%s4617_s13 + $0x60] sm:$0xff] %v2884_v57  ;;  %2901 = vst [vmem:[%s4617_s13 + $0x68] sm:$0xff] %v2885_v54 }
 0x38e   : > { %v3686_v26 = vpop.eup %3685 }
 0x38f   : > { %v2830_v0 = vmul.f32 %v3686_v26, %v4626_v39  ;;  %v2831_v1 = vmul.f32 %v3686_v26, %v4629_v53 }
 0x391   : > { %v2850_v17 = vmul.f32 %v4601_v3, %v2830_v0  ;;  %v2851_v55 = vmul.f32 %v4601_v3, %v2831_v1 }
 0x393   : > { %v2870_v9 = vadd.f32 %v4605_v2, %v2850_v17  ;;  %v2871_v20 = vadd.f32 %v4605_v2, %v2851_v55 }
 0x395   : > { %v2886_v39 = vmax.f32 %v2870_v9, 0.0  ;;  %v2887_v53 = vmax.f32 %v2871_v20, 0.0 }
 0x397   : > { %2902 = vst [vmem:[%s4617_s13 + $0x70] sm:$0xff] %v2886_v39  ;;  %2903 = vst [vmem:[%s4617_s13 + $0x78] sm:$0xff] %v2887_v53 }
 0x398   : > { %3796 = shalt.err (!%p3793_p11)
}
 0x399   : > { %s3797_s25 = scalar_lea.hbm %s4686_s21, 2048  ;;  %s3801_s26 = scalar_lea.hbm %s4741_s8, 4096 }
 0x39a   : > { %p3798_p9 = scmp.ne.s32.totalorder %s4686_s21, %s3797_s25  ;;  %p3802_p6 = scmp.lt.s32.totalorder %s4686_s21, %s4741_s8 }
 0x39b   : > { %p3803_p8 = scmp.lt.s32.totalorder %s3801_s26, %s3797_s25 }
 0x39c   : > { %p3799_p1 = pnand %p3798_p9, %p4764_p7 }
 0x39d   : > { %p3804_p5 = por %p3803_p8, %p3802_p6 }
 0x39e   : > { %p3800_p4 = pneg %p3799_p1 }
 0x3a0   : > { %p3805_p2 = pnand %p3804_p5, %p3800_p4 }
 0x3a2   : > { %3808 = shalt.err (!%p3805_p2)
}
 0x3a3   : > { %s3859_s19 = smov 128   ;;  %s3860_s18 = smov 8  }
 0x3a4   : > { %3594 = dma.vmem_to_hbm [thread:$0]  (%p4764_p7), %s4688_s15, 2048, %s4686_s21, %s2905_s9, %s3859_s19, %s3859_s19, %s3860_s18  }
 0x3a5 PF: > { %s2934_s23 = sand.u32 1, %s3839_s27   ;;  %p4765_p12 = scmp.ne.s32.totalorder %s4751_s12, 0 }
 0x3a6   : > { %p4766_p13 = scmp.ge.s32.totalorder %s3851_s30, 2  ;;  %s2935_s20 = scalar_lea.sflag [#allocation4], %s2934_s23 }
 0x3a8   : > { %p3608_p0 = pnand %p4766_p13, %p4765_p12 }
 0x3aa   : > { %p3609_p10 = pneg %p3608_p0 }
 0x3ac   : > { %3834 = dma.done.wait (%p3609_p10), %s2935_s20, 2048  }
 0x3ad   : > { %3836 = vsyncadd (%p3609_p10), %s2935_s20, 4294965248  ;;  %p22_p3 = scmp.ge.s32.totalorder %s3981_s10, 4   ;;  %s4767_s27 = smov %s3843_s28 }
 0x3ae   : > { %s4768_s28 = smov %s3847_s29  ;;  %s4769_s29 = smov %s3997_s17 }
 0x3af   : > { %s4770_s30 = smov %s3981_s10  ;;  %24 = sbr.rel (!%p22_p3) target bundleno = 9 (0x9), region = 114 }
 0x3b4   :  { %2940 = vsyncpa [#allocation3], 1 }
 0x3b5   :  { %2942 = vsyncpa [#allocation3 + $0x1], 1 }
 0x3b6   :  { %2943 = vsyncpa [#allocation6], 1 }
 0x3b7   :  { %2944 = vsyncpa [#allocation4], 1 }
 0x3b8   :  { %2946 = vsyncpa [#allocation4 + $0x1], 1 }

</bundles_post_ra>
